<compile_context>
chip_gen: v5e
topology: v5e:2x2
jax: 0.10.0
libtpu: 0.0.40
codegen_flags: <defaults>
</compile_context>

<pallas_src>
import jax
import jax.numpy as jnp
from jax.experimental import pallas as pl
from jax.experimental.pallas import tpu as pltpu

# 21 residue classes (stand-in for torchdrug constant.ID_TO_AA)
ID_TO_AA = list("GAVLIPFYWSTCMNQDEKRHX")
NUM_RES_TYPES = len(ID_TO_AA)

LANE = 128


def _rup(x, m):
    return ((x + m - 1) // m) * m


def _pad2(x, rows, cols):
    return jnp.pad(x, ((0, rows - x.shape[0]), (0, cols - x.shape[1])))


# --------------------------- fused Pallas kernel ------------------------------

def _fused_diffusion_kernel(
        scal_ref, gamma_ref,                               # SMEM scalar tables
        pos0_ref, feat_ref, sdiff_ref, soutT_ref, mu_ref,
        w1a_ref, w1b_ref, b1_ref, wt_ref, w2_ref, b2_ref, wseq_ref, bseq_ref,
        noise_ref,                                         # per-step noise block
        pos_out_ref, logits_ref,                           # outputs
        pos_acc, hfeat_acc):                               # VMEM scratch
    s = pl.program_id(0)
    last = pl.num_programs(0) - 1

    @pl.when(s == 0)
    def _():
        # load initial positions + precompute the step-invariant feature branch
        pos_acc[...] = pos0_ref[...]
        hfeat_acc[...] = (jnp.dot(feat_ref[...], w1a_ref[...],
                                  preferred_element_type=jnp.float32)
                          + b1_ref[...])

    sigma = scal_ref[s, 0]            # sqrt(1 - alpha_cumprod_t)
    coef = scal_ref[s, 1]             # sqrt(beta_t) / sqrt(alpha_t)
    inv_sqrt_alpha = scal_ref[s, 2]   # 1 / sqrt(alpha_t)
    t_frac = scal_ref[s, 3]           # t / num_noise_level
    gamma = gamma_ref[0]

    # perturb: node_position += randn * sqrt(1 - alpha_cumprod_t)
    pos = pos_acc[...] + noise_ref[...] * sigma

    # fused edge gather: pos[node_in] - pos[node_out] = (S_in - S_out) @ pos
    # (one f32 MXU matmul instead of two)
    diff = jnp.dot(sdiff_ref[...], pos, preferred_element_type=jnp.float32)
    d = jnp.sqrt(jnp.sum(diff * diff, axis=-1, keepdims=True))       # [E_pad, 1]

    # RBF featurization + segment_sum (scatter-add) as S_out^T @ rbf (bf16 MXU)
    delta = d - mu_ref[...]                                           # [E_pad, K_pad]
    rbf = jnp.exp(-gamma * delta * delta)
    dist_feat = jnp.dot(soutT_ref[...], rbf.astype(soutT_ref.dtype),
                        preferred_element_type=jnp.float32)           # [N_pad, K_pad]

    # struct_predict MLP (time conditioned)
    h = (hfeat_acc[...]
         + jnp.dot(dist_feat.astype(w1b_ref.dtype), w1b_ref[...],
                   preferred_element_type=jnp.float32)
         + t_frac * wt_ref[...])
    h = jnp.maximum(h, 0.0)
    struct_pred = (jnp.dot(h, w2_ref[...], preferred_element_type=jnp.float32)
                   + b2_ref[...])

    # node_position = (node_position - struct_pred * sqrt(beta_t)) / sqrt(alpha_t)
    new_pos = pos * inv_sqrt_alpha - struct_pred * coef
    pos_acc[...] = new_pos
    pos_out_ref[...] = new_pos

    # seq_predict logits (only meaningful at t == 0, i.e. the last grid step)
    @pl.when(s == last)
    def _():
        logits_ref[...] = (jnp.dot(feat_ref[...], wseq_ref[...],
                                   preferred_element_type=jnp.float32)
                           + bseq_ref[...])


# --------------------------- pallas_call wrapper ------------------------------

@jax.jit
def _run_reverse_diffusion(scal, gamma, pos0, feat, s_diff, s_out_t, mu,
                           w1a, w1b, b1, w_t, w2, b2, w_seq, b_seq, noise):
    num_steps, n_pad, p_pad = noise.shape
    h_pad = w1a.shape[1]
    c_pad = w_seq.shape[1]

    smem = pl.BlockSpec(memory_space=pltpu.MemorySpace.SMEM)

    def resident(arr):
        # whole-array VMEM block, constant index map -> fetched once, resident
        nd = arr.ndim
        return pl.BlockSpec(arr.shape, lambda s: (0,) * nd)

    return pl.pallas_call(
        _fused_diffusion_kernel,
        grid=(num_steps,),
        in_specs=[
            smem, smem,
            resident(pos0), resident(feat), resident(s_diff),
            resident(s_out_t), resident(mu), resident(w1a), resident(w1b),
            resident(b1), resident(w_t), resident(w2), resident(b2),
            resident(w_seq), resident(b_seq),
            pl.BlockSpec((None, n_pad, p_pad), lambda s: (s, 0, 0)),
        ],
        out_specs=(
            pl.BlockSpec((None, n_pad, p_pad), lambda s: (s, 0, 0)),
            pl.BlockSpec((n_pad, c_pad), lambda s: (0, 0)),
        ),
        out_shape=(
            jax.ShapeDtypeStruct((num_steps, n_pad, p_pad), jnp.float32),
            jax.ShapeDtypeStruct((n_pad, c_pad), jnp.float32),
        ),
        scratch_shapes=[
            pltpu.VMEM((n_pad, p_pad), jnp.float32),   # resident positions
            pltpu.VMEM((n_pad, h_pad), jnp.float32),   # feat @ w1a + b1 (step-invariant)
        ],
        compiler_params=pltpu.CompilerParams(
            dimension_semantics=("arbitrary",)),
    )(scal, gamma, pos0, feat, s_diff, s_out_t, mu,
      w1a, w1b, b1, w_t, w2, b2, w_seq, b_seq, noise)


# --------------------------- synthetic "model" --------------------------------
# TODO(synk): the original takes an arbitrary `model` (struct_predict /
# seq_predict); a deterministic RBF+MLP denoiser and a linear sequence head are
# synthesized here with the same call signatures / output shapes.

def init_params(key, D, H, K):
    ks = jax.random.split(key, 5)
    s = 0.1
    return {
        "w1a": jax.random.normal(ks[0], (D, H), jnp.float32) * s,
        "w1b": jax.random.normal(ks[1], (K, H), jnp.float32) * s,
        "b1": jnp.zeros((1, H), jnp.float32),
        "w_t": jax.random.normal(ks[2], (1, H), jnp.float32) * s,
        "w2": jax.random.normal(ks[3], (H, 3), jnp.float32) * s,
        "b2": jnp.zeros((1, 3), jnp.float32),
        "w_seq": jax.random.normal(ks[4], (D, NUM_RES_TYPES), jnp.float32) * s,
        "b_seq": jnp.zeros((1, NUM_RES_TYPES), jnp.float32),
        "mu": jnp.linspace(0.0, 8.0, K, dtype=jnp.float32).reshape(1, K),
        "gamma": jnp.array([2.0], jnp.float32),
    }


# --------------------------- the module ---------------------------------------

class DiffusionProteinGeneratorPallas:
    def __init__(self, params, num_noise_level, sigma_begin, sigma_end):
        self.params = params
        self.num_noise_level = num_noise_level
        betas = jnp.linspace(-6.0, 6.0, num_noise_level)
        self.betas = jax.nn.sigmoid(betas) * (sigma_end - sigma_begin) + sigma_begin
        self.alphas = 1.0 - self.betas
        self.alphas_cumprod = jnp.cumprod(self.alphas)

    def forward(self, graph, num_steps, rng):
        p = self.params
        pos = graph["node_position"].astype(jnp.float32)
        feat = graph["node_feature"].astype(jnp.float32)
        node_in = graph["edge_list"][:, 0]
        node_out = graph["edge_list"][:, 1]

        N, D = feat.shape
        E = node_in.shape[0]
        H = p["w1a"].shape[1]
        K = p["mu"].shape[1]
        C = p["w_seq"].shape[1]

        n_pad, e_pad = _rup(N, LANE), _rup(E, LANE)
        d_pad, h_pad = _rup(D, LANE), _rup(H, LANE)
        k_pad, c_pad = _rup(K, LANE), _rup(C, LANE)
        p_pad = LANE  # xyz (3) padded to a full lane width

        # per-step scalar table; row s corresponds to t = num_steps-1-s
        ts = jnp.arange(num_steps - 1, -1, -1)
        scal = jnp.stack([
            jnp.sqrt(1.0 - self.alphas_cumprod[ts]),
            jnp.sqrt(self.betas[ts]) / jnp.sqrt(self.alphas[ts]),
            1.0 / jnp.sqrt(self.alphas[ts]),
            ts.astype(jnp.float32) / jnp.float32(self.num_noise_level),
        ], axis=1).astype(jnp.float32)

        # all perturbation noise up-front; padded lanes / rows stay zero
        noise = jax.random.normal(rng, (num_steps, N, 3), jnp.float32)
        noise = jnp.pad(noise, ((0, 0), (0, n_pad - N), (0, p_pad - 3)))

        # incidence matrices: gather + segment_sum become MXU matmuls.
        # S_diff fuses the two per-edge gathers into one matmul.
        oh_in = jax.nn.one_hot(node_in, n_pad, dtype=jnp.float32)
        oh_out = jax.nn.one_hot(node_out, n_pad, dtype=jnp.float32)
        s_diff = _pad2(oh_in - oh_out, e_pad, n_pad)                  # f32 {-1,0,1}
        s_out_t = _pad2(oh_out, e_pad, n_pad).T.astype(jnp.bfloat16)  # exact in bf16

        pos0 = _pad2(pos, n_pad, p_pad)
        feat_p = _pad2(feat, n_pad, d_pad).astype(jnp.bfloat16)
        mu_p = _pad2(p["mu"], 1, k_pad)
        w1a = _pad2(p["w1a"], d_pad, h_pad).astype(jnp.bfloat16)
        w1b = _pad2(p["w1b"], k_pad, h_pad).astype(jnp.bfloat16)
        b1 = _pad2(p["b1"], 1, h_pad)
        w_t = _pad2(p["w_t"], 1, h_pad)
        w2 = _pad2(p["w2"], h_pad, p_pad)
        b2 = _pad2(p["b2"], 1, p_pad)
        w_seq = _pad2(p["w_seq"], d_pad, c_pad).astype(jnp.bfloat16)
        b_seq = _pad2(p["b_seq"], 1, c_pad)

        pos_steps, logits = _run_reverse_diffusion(
            scal, p["gamma"], pos0, feat_p, s_diff, s_out_t, mu_p,
            w1a, w1b, b1, w_t, w2, b2, w_seq, b_seq, noise)

        # single host sync, after all device work has been enqueued
        pred_ids = jax.device_get(
            jnp.argmax(logits[:N, :NUM_RES_TYPES], axis=-1))
        predicted_sequence = ''.join(ID_TO_AA[int(i)] for i in pred_ids)

        # graph.clone() bookkeeping (host side, lazy slices of the kernel output)
        graph_list = [dict(graph)]
        for s in range(num_steps):
            g = dict(graph)
            g["node_position"] = pos_steps[s, :N, :3]
            graph_list.append(g)
        return graph_list[::-1], predicted_sequence


# --------------------------- demo ---------------------------------------------

if __name__ == "__main__":
    N, D, H, K, E = 32, 32, 64, 16, 64
    num_noise_level, sigma_begin, sigma_end = 10, 1e-4, 2e-2
    num_steps = 4

    key = jax.random.PRNGKey(0)
    k_pos, k_feat, k_param, k_noise = jax.random.split(key, 4)

    idx = jnp.arange(E, dtype=jnp.int32)
    node_in = idx % N
    node_out = (idx % N + 1 + (idx // N) * 4) % N
    graph = {
        "node_position": jax.random.normal(k_pos, (N, 3), jnp.float32) * 3.0,
        "node_feature": jax.random.normal(k_feat, (N, D), jnp.float32),
        "edge_list": jnp.stack([node_in, node_out], axis=1),
    }

    params = init_params(k_param, D, H, K)
    gen = DiffusionProteinGeneratorPallas(params, num_noise_level,
                                          sigma_begin, sigma_end)

    graph_list, sequence = gen.forward(graph, num_steps, k_noise)
    final_pos = jax.block_until_ready(graph_list[0]["node_position"])

    assert len(graph_list) == num_steps + 1
    assert final_pos.shape == (N, 3)
    assert bool(jnp.all(jnp.isfinite(final_pos)))
    assert sequence is not None and len(sequence) == N
    print("KERNEL_OK")
</pallas_src>

<mosaic_0001>
module attributes {stable_mosaic.version = 11 : i64} {
  func.func @_fused_diffusion_kernel(%arg0: i32, %arg1: memref<4x4xf32, #tpu.memory_space<smem>>, %arg2: memref<1xf32, #tpu.memory_space<smem>>, %arg3: memref<128x128xf32, #tpu.memory_space<vmem>>, %arg4: memref<128x128xbf16, #tpu.memory_space<vmem>>, %arg5: memref<128x128xf32, #tpu.memory_space<vmem>>, %arg6: memref<128x128xbf16, #tpu.memory_space<vmem>>, %arg7: memref<1x128xf32, #tpu.memory_space<vmem>>, %arg8: memref<128x128xbf16, #tpu.memory_space<vmem>>, %arg9: memref<128x128xbf16, #tpu.memory_space<vmem>>, %arg10: memref<1x128xf32, #tpu.memory_space<vmem>>, %arg11: memref<1x128xf32, #tpu.memory_space<vmem>>, %arg12: memref<128x128xf32, #tpu.memory_space<vmem>>, %arg13: memref<1x128xf32, #tpu.memory_space<vmem>>, %arg14: memref<128x128xbf16, #tpu.memory_space<vmem>>, %arg15: memref<1x128xf32, #tpu.memory_space<vmem>>, %arg16: memref<1x128x128xf32, #tpu.memory_space<vmem>>, %arg17: memref<1x128x128xf32, #tpu.memory_space<vmem>>, %arg18: memref<128x128xf32, #tpu.memory_space<vmem>>, %arg19: memref<128x128xf32, #tpu.memory_space<vmem>>, %arg20: memref<128x128xf32, #tpu.memory_space<vmem>>) attributes {dimension_semantics = [#tpu.dimension_semantics<arbitrary>], iteration_bounds = array<i64: 4>, scalar_prefetch = 0 : i64, scratch_operands = 2 : i64, tpu.core_type = #tpu.core_type<tc>, window_params = [{transform_indices = @transform_0, window_bounds = array<i64: 4, 4>}, {transform_indices = @transform_1, window_bounds = array<i64: 1>}, {pipeline_mode = #tpu.pipeline_mode<synchronous>, transform_indices = @transform_2, window_bounds = array<i64: 128, 128>}, {pipeline_mode = #tpu.pipeline_mode<synchronous>, transform_indices = @transform_3, window_bounds = array<i64: 128, 128>}, {pipeline_mode = #tpu.pipeline_mode<synchronous>, transform_indices = @transform_4, window_bounds = array<i64: 128, 128>}, {pipeline_mode = #tpu.pipeline_mode<synchronous>, transform_indices = @transform_5, window_bounds = array<i64: 128, 128>}, {pipeline_mode = #tpu.pipeline_mode<synchronous>, transform_indices = @transform_6, window_bounds = array<i64: 1, 128>}, {pipeline_mode = #tpu.pipeline_mode<synchronous>, transform_indices = @transform_7, window_bounds = array<i64: 128, 128>}, {pipeline_mode = #tpu.pipeline_mode<synchronous>, transform_indices = @transform_8, window_bounds = array<i64: 128, 128>}, {pipeline_mode = #tpu.pipeline_mode<synchronous>, transform_indices = @transform_9, window_bounds = array<i64: 1, 128>}, {pipeline_mode = #tpu.pipeline_mode<synchronous>, transform_indices = @transform_10, window_bounds = array<i64: 1, 128>}, {pipeline_mode = #tpu.pipeline_mode<synchronous>, transform_indices = @transform_11, window_bounds = array<i64: 128, 128>}, {pipeline_mode = #tpu.pipeline_mode<synchronous>, transform_indices = @transform_12, window_bounds = array<i64: 1, 128>}, {pipeline_mode = #tpu.pipeline_mode<synchronous>, transform_indices = @transform_13, window_bounds = array<i64: 128, 128>}, {pipeline_mode = #tpu.pipeline_mode<synchronous>, transform_indices = @transform_14, window_bounds = array<i64: 1, 128>}, {transform_indices = @transform_15, window_bounds = array<i64: 1, 128, 128>}, {transform_indices = @transform_16, window_bounds = array<i64: 1, 128, 128>}, {pipeline_mode = #tpu.pipeline_mode<synchronous>, transform_indices = @transform_17, window_bounds = array<i64: 128, 128>}]} {
    %c0_i32 = arith.constant 0 : i32
    %0 = arith.cmpi eq, %arg0, %c0_i32 : i32
    %1 = arith.extui %0 : i1 to i32
    %c0_i32_0 = arith.constant 0 : i32
    %2 = arith.cmpi ne, %1, %c0_i32_0 : i32
    scf.if %2 {
      %c0_35 = arith.constant 0 : index
      %c0_36 = arith.constant 0 : index
      %65 = vector.load %arg3[%c0_35, %c0_36] : memref<128x128xf32, #tpu.memory_space<vmem>>, vector<128x128xf32>
      %c0_37 = arith.constant 0 : index
      %c0_38 = arith.constant 0 : index
      %66 = vector.load %arg19[%c0_37, %c0_38] : memref<128x128xf32, #tpu.memory_space<vmem>>, vector<128x128xf32>
      tpu.vector_store %arg19[%c0_37, %c0_38], %65 {strides = array<i32>} : memref<128x128xf32, #tpu.memory_space<vmem>>, vector<128x128xf32>,
      %c0_39 = arith.constant 0 : index
      %c0_40 = arith.constant 0 : index
      %67 = vector.load %arg4[%c0_39, %c0_40] : memref<128x128xbf16, #tpu.memory_space<vmem>>, vector<128x128xbf16>
      %c0_41 = arith.constant 0 : index
      %c0_42 = arith.constant 0 : index
      %68 = vector.load %arg8[%c0_41, %c0_42] : memref<128x128xbf16, #tpu.memory_space<vmem>>, vector<128x128xbf16>
      %cst_43 = arith.constant dense<0.000000e+00> : vector<128x128xf32>
      %69 = tpu.matmul %67, %68, %cst_43 {dimension_numbers = #tpu.dot_dimension_numbers<[1], [0], [0], [1], [0, 0, 1, 1], [], []>} : vector<128x128xbf16>, vector<128x128xbf16>, vector<128x128xf32> -> vector<128x128xf32>
      %c0_44 = arith.constant 0 : index
      %c0_45 = arith.constant 0 : index
      %70 = vector.load %arg10[%c0_44, %c0_45] : memref<1x128xf32, #tpu.memory_space<vmem>>, vector<1x128xf32>
      %71 = vector.broadcast %70 : vector<1x128xf32> to vector<128x128xf32>
      %72 = arith.addf %69, %71 : vector<128x128xf32>
      %c0_46 = arith.constant 0 : index
      %c0_47 = arith.constant 0 : index
      %73 = vector.load %arg20[%c0_46, %c0_47] : memref<128x128xf32, #tpu.memory_space<vmem>>, vector<128x128xf32>
      tpu.vector_store %arg20[%c0_46, %c0_47], %72 {strides = array<i32>} : memref<128x128xf32, #tpu.memory_space<vmem>>, vector<128x128xf32>,
    } else {
    }
    %3 = arith.index_cast %arg0 : i32 to index
    %c0 = arith.constant 0 : index
    %4 = memref.load %arg1[%3, %c0] : memref<4x4xf32, #tpu.memory_space<smem>>
    %5 = arith.index_cast %arg0 : i32 to index
    %c1 = arith.constant 1 : index
    %6 = memref.load %arg1[%5, %c1] : memref<4x4xf32, #tpu.memory_space<smem>>
    %7 = arith.index_cast %arg0 : i32 to index
    %c2 = arith.constant 2 : index
    %8 = memref.load %arg1[%7, %c2] : memref<4x4xf32, #tpu.memory_space<smem>>
    %9 = arith.index_cast %arg0 : i32 to index
    %c3 = arith.constant 3 : index
    %10 = memref.load %arg1[%9, %c3] : memref<4x4xf32, #tpu.memory_space<smem>>
    %c0_1 = arith.constant 0 : index
    %11 = memref.load %arg2[%c0_1] : memref<1xf32, #tpu.memory_space<smem>>
    %c0_2 = arith.constant 0 : index
    %c0_3 = arith.constant 0 : index
    %12 = vector.load %arg19[%c0_2, %c0_3] : memref<128x128xf32, #tpu.memory_space<vmem>>, vector<128x128xf32>
    %c0_4 = arith.constant 0 : index
    %c0_5 = arith.constant 0 : index
    %c0_6 = arith.constant 0 : index
    %13 = vector.load %arg16[%c0_4, %c0_5, %c0_6] : memref<1x128x128xf32, #tpu.memory_space<vmem>>, vector<1x128x128xf32>
    %14 = vector.shape_cast %13 : vector<1x128x128xf32> to vector<128x128xf32>
    %15 = vector.broadcast %4 : f32 to vector<128x128xf32>
    %16 = arith.mulf %14, %15 : vector<128x128xf32>
    %17 = arith.addf %12, %16 : vector<128x128xf32>
    %c0_7 = arith.constant 0 : index
    %c0_8 = arith.constant 0 : index
    %18 = vector.load %arg5[%c0_7, %c0_8] : memref<128x128xf32, #tpu.memory_space<vmem>>, vector<128x128xf32>
    %cst = arith.constant dense<0.000000e+00> : vector<128x128xf32>
    %19 = tpu.matmul %18, %17, %cst {dimension_numbers = #tpu.dot_dimension_numbers<[1], [0], [0], [1], [0, 0, 1, 1], [], []>} : vector<128x128xf32>, vector<128x128xf32>, vector<128x128xf32> -> vector<128x128xf32>
    %20 = arith.mulf %19, %19 : vector<128x128xf32>
    %cst_9 = arith.constant dense<0.000000e+00> : vector<128xf32>
    %21 = vector.multi_reduction <add>, %20, %cst_9 [1] : vector<128x128xf32> to vector<128xf32>
    %22 = vector.shape_cast %21 : vector<128xf32> to vector<128x1xf32>
    %23 = math.sqrt %22 : vector<128x1xf32>
    %c0_10 = arith.constant 0 : index
    %c0_11 = arith.constant 0 : index
    %24 = vector.load %arg7[%c0_10, %c0_11] : memref<1x128xf32, #tpu.memory_space<vmem>>, vector<1x128xf32>
    %25 = vector.broadcast %23 : vector<128x1xf32> to vector<128x128xf32>
    %26 = vector.broadcast %24 : vector<1x128xf32> to vector<128x128xf32>
    %27 = arith.subf %25, %26 : vector<128x128xf32>
    %cst_12 = arith.constant 0.000000e+00 : f32
    %28 = arith.subf %cst_12, %11 : f32
    %29 = vector.broadcast %28 : f32 to vector<128x128xf32>
    %30 = arith.mulf %29, %27 : vector<128x128xf32>
    %31 = arith.mulf %30, %27 : vector<128x128xf32>
    %32 = math.exp %31 : vector<128x128xf32>
    %c0_13 = arith.constant 0 : index
    %c0_14 = arith.constant 0 : index
    %33 = vector.load %arg6[%c0_13, %c0_14] : memref<128x128xbf16, #tpu.memory_space<vmem>>, vector<128x128xbf16>
    %34 = arith.truncf %32 : vector<128x128xf32> to vector<128x128xbf16>
    %cst_15 = arith.constant dense<0.000000e+00> : vector<128x128xf32>
    %35 = tpu.matmul %33, %34, %cst_15 {dimension_numbers = #tpu.dot_dimension_numbers<[1], [0], [0], [1], [0, 0, 1, 1], [], []>} : vector<128x128xbf16>, vector<128x128xbf16>, vector<128x128xf32> -> vector<128x128xf32>
    %c0_16 = arith.constant 0 : index
    %c0_17 = arith.constant 0 : index
    %36 = vector.load %arg20[%c0_16, %c0_17] : memref<128x128xf32, #tpu.memory_space<vmem>>, vector<128x128xf32>
    %37 = arith.truncf %35 : vector<128x128xf32> to vector<128x128xbf16>
    %c0_18 = arith.constant 0 : index
    %c0_19 = arith.constant 0 : index
    %38 = vector.load %arg9[%c0_18, %c0_19] : memref<128x128xbf16, #tpu.memory_space<vmem>>, vector<128x128xbf16>
    %cst_20 = arith.constant dense<0.000000e+00> : vector<128x128xf32>
    %39 = tpu.matmul %37, %38, %cst_20 {dimension_numbers = #tpu.dot_dimension_numbers<[1], [0], [0], [1], [0, 0, 1, 1], [], []>} : vector<128x128xbf16>, vector<128x128xbf16>, vector<128x128xf32> -> vector<128x128xf32>
    %40 = arith.addf %36, %39 : vector<128x128xf32>
    %c0_21 = arith.constant 0 : index
    %c0_22 = arith.constant 0 : index
    %41 = vector.load %arg11[%c0_21, %c0_22] : memref<1x128xf32, #tpu.memory_space<vmem>>, vector<1x128xf32>
    %42 = vector.broadcast %10 : f32 to vector<1x128xf32>
    %43 = arith.mulf %42, %41 : vector<1x128xf32>
    %44 = vector.broadcast %43 : vector<1x128xf32> to vector<128x128xf32>
    %45 = arith.addf %40, %44 : vector<128x128xf32>
    %cst_23 = arith.constant 0.000000e+00 : f32
    %46 = vector.broadcast %cst_23 : f32 to vector<128x128xf32>
    %47 = arith.maximumf %45, %46 : vector<128x128xf32>
    %c0_24 = arith.constant 0 : index
    %c0_25 = arith.constant 0 : index
    %48 = vector.load %arg12[%c0_24, %c0_25] : memref<128x128xf32, #tpu.memory_space<vmem>>, vector<128x128xf32>
    %cst_26 = arith.constant dense<0.000000e+00> : vector<128x128xf32>
    %49 = tpu.matmul %47, %48, %cst_26 {dimension_numbers = #tpu.dot_dimension_numbers<[1], [0], [0], [1], [0, 0, 1, 1], [], []>} : vector<128x128xf32>, vector<128x128xf32>, vector<128x128xf32> -> vector<128x128xf32>
    %c0_27 = arith.constant 0 : index
    %c0_28 = arith.constant 0 : index
    %50 = vector.load %arg13[%c0_27, %c0_28] : memref<1x128xf32, #tpu.memory_space<vmem>>, vector<1x128xf32>
    %51 = vector.broadcast %50 : vector<1x128xf32> to vector<128x128xf32>
    %52 = arith.addf %49, %51 : vector<128x128xf32>
    %53 = vector.broadcast %8 : f32 to vector<128x128xf32>
    %54 = arith.mulf %17, %53 : vector<128x128xf32>
    %55 = vector.broadcast %6 : f32 to vector<128x128xf32>
    %56 = arith.mulf %52, %55 : vector<128x128xf32>
    %57 = arith.subf %54, %56 : vector<128x128xf32>
    %c0_29 = arith.constant 0 : index
    %c0_30 = arith.constant 0 : index
    %58 = vector.load %arg19[%c0_29, %c0_30] : memref<128x128xf32, #tpu.memory_space<vmem>>, vector<128x128xf32>
    tpu.vector_store %arg19[%c0_29, %c0_30], %57 {strides = array<i32>} : memref<128x128xf32, #tpu.memory_space<vmem>>, vector<128x128xf32>,
    %c0_31 = arith.constant 0 : index
    %c0_32 = arith.constant 0 : index
    %c0_33 = arith.constant 0 : index
    %59 = vector.load %arg17[%c0_31, %c0_32, %c0_33] : memref<1x128x128xf32, #tpu.memory_space<vmem>>, vector<1x128x128xf32>
    %60 = vector.shape_cast %59 : vector<1x128x128xf32> to vector<128x128xf32>
    %61 = vector.shape_cast %57 : vector<128x128xf32> to vector<1x128x128xf32>
    tpu.vector_store %arg17[%c0_31, %c0_32, %c0_33], %61 {strides = array<i32>} : memref<1x128x128xf32, #tpu.memory_space<vmem>>, vector<1x128x128xf32>,
    %c3_i32 = arith.constant 3 : i32
    %62 = arith.cmpi eq, %arg0, %c3_i32 : i32
    %63 = arith.extui %62 : i1 to i32
    %c0_i32_34 = arith.constant 0 : i32
    %64 = arith.cmpi ne, %63, %c0_i32_34 : i32
    scf.if %64 {
      %c0_35 = arith.constant 0 : index
      %c0_36 = arith.constant 0 : index
      %65 = vector.load %arg4[%c0_35, %c0_36] : memref<128x128xbf16, #tpu.memory_space<vmem>>, vector<128x128xbf16>
      %c0_37 = arith.constant 0 : index
      %c0_38 = arith.constant 0 : index
      %66 = vector.load %arg14[%c0_37, %c0_38] : memref<128x128xbf16, #tpu.memory_space<vmem>>, vector<128x128xbf16>
      %cst_39 = arith.constant dense<0.000000e+00> : vector<128x128xf32>
      %67 = tpu.matmul %65, %66, %cst_39 {dimension_numbers = #tpu.dot_dimension_numbers<[1], [0], [0], [1], [0, 0, 1, 1], [], []>} : vector<128x128xbf16>, vector<128x128xbf16>, vector<128x128xf32> -> vector<128x128xf32>
      %c0_40 = arith.constant 0 : index
      %c0_41 = arith.constant 0 : index
      %68 = vector.load %arg15[%c0_40, %c0_41] : memref<1x128xf32, #tpu.memory_space<vmem>>, vector<1x128xf32>
      %69 = vector.broadcast %68 : vector<1x128xf32> to vector<128x128xf32>
      %70 = arith.addf %67, %69 : vector<128x128xf32>
      %c0_42 = arith.constant 0 : index
      %c0_43 = arith.constant 0 : index
      %71 = vector.load %arg18[%c0_42, %c0_43] : memref<128x128xf32, #tpu.memory_space<vmem>>, vector<128x128xf32>
      tpu.vector_store %arg18[%c0_42, %c0_43], %70 {strides = array<i32>} : memref<128x128xf32, #tpu.memory_space<vmem>>, vector<128x128xf32>,
    } else {
    }
    return
  }
  func.func @transform_0(%arg0: i32) -> (i32, i32) {
    %c0_i32 = arith.constant 0 : i32
    %c0_i32_0 = arith.constant 0 : i32
    %c0_i32_1 = arith.constant 0 : i32
    return %c0_i32, %c0_i32_0 : i32, i32
  }
  func.func @transform_1(%arg0: i32) -> i32 {
    %c0_i32 = arith.constant 0 : i32
    %c0_i32_0 = arith.constant 0 : i32
    return %c0_i32 : i32
  }
  func.func @transform_2(%arg0: i32) -> (i32, i32) {
    %c0_i32 = arith.constant 0 : i32
    %c0_i32_0 = arith.constant 0 : i32
    %c0_i32_1 = arith.constant 0 : i32
    return %c0_i32, %c0_i32_0 : i32, i32
  }
  func.func @transform_3(%arg0: i32) -> (i32, i32) {
    %c0_i32 = arith.constant 0 : i32
    %c0_i32_0 = arith.constant 0 : i32
    %c0_i32_1 = arith.constant 0 : i32
    return %c0_i32, %c0_i32_0 : i32, i32
  }
  func.func @transform_4(%arg0: i32) -> (i32, i32) {
    %c0_i32 = arith.constant 0 : i32
    %c0_i32_0 = arith.constant 0 : i32
    %c0_i32_1 = arith.constant 0 : i32
    return %c0_i32, %c0_i32_0 : i32, i32
  }
  func.func @transform_5(%arg0: i32) -> (i32, i32) {
    %c0_i32 = arith.constant 0 : i32
    %c0_i32_0 = arith.constant 0 : i32
    %c0_i32_1 = arith.constant 0 : i32
    return %c0_i32, %c0_i32_0 : i32, i32
  }
  func.func @transform_6(%arg0: i32) -> (i32, i32) {
    %c0_i32 = arith.constant 0 : i32
    %c0_i32_0 = arith.constant 0 : i32
    %c0_i32_1 = arith.constant 0 : i32
    return %c0_i32, %c0_i32_0 : i32, i32
  }
  func.func @transform_7(%arg0: i32) -> (i32, i32) {
    %c0_i32 = arith.constant 0 : i32
    %c0_i32_0 = arith.constant 0 : i32
    %c0_i32_1 = arith.constant 0 : i32
    return %c0_i32, %c0_i32_0 : i32, i32
  }
  func.func @transform_8(%arg0: i32) -> (i32, i32) {
    %c0_i32 = arith.constant 0 : i32
    %c0_i32_0 = arith.constant 0 : i32
    %c0_i32_1 = arith.constant 0 : i32
    return %c0_i32, %c0_i32_0 : i32, i32
  }
  func.func @transform_9(%arg0: i32) -> (i32, i32) {
    %c0_i32 = arith.constant 0 : i32
    %c0_i32_0 = arith.constant 0 : i32
    %c0_i32_1 = arith.constant 0 : i32
    return %c0_i32, %c0_i32_0 : i32, i32
  }
  func.func @transform_10(%arg0: i32) -> (i32, i32) {
    %c0_i32 = arith.constant 0 : i32
    %c0_i32_0 = arith.constant 0 : i32
    %c0_i32_1 = arith.constant 0 : i32
    return %c0_i32, %c0_i32_0 : i32, i32
  }
  func.func @transform_11(%arg0: i32) -> (i32, i32) {
    %c0_i32 = arith.constant 0 : i32
    %c0_i32_0 = arith.constant 0 : i32
    %c0_i32_1 = arith.constant 0 : i32
    return %c0_i32, %c0_i32_0 : i32, i32
  }
  func.func @transform_12(%arg0: i32) -> (i32, i32) {
    %c0_i32 = arith.constant 0 : i32
    %c0_i32_0 = arith.constant 0 : i32
    %c0_i32_1 = arith.constant 0 : i32
    return %c0_i32, %c0_i32_0 : i32, i32
  }
  func.func @transform_13(%arg0: i32) -> (i32, i32) {
    %c0_i32 = arith.constant 0 : i32
    %c0_i32_0 = arith.constant 0 : i32
    %c0_i32_1 = arith.constant 0 : i32
    return %c0_i32, %c0_i32_0 : i32, i32
  }
  func.func @transform_14(%arg0: i32) -> (i32, i32) {
    %c0_i32 = arith.constant 0 : i32
    %c0_i32_0 = arith.constant 0 : i32
    %c0_i32_1 = arith.constant 0 : i32
    return %c0_i32, %c0_i32_0 : i32, i32
  }
  func.func @transform_15(%arg0: i32) -> (i32, i32, i32) {
    %c0_i32 = arith.constant 0 : i32
    %c0_i32_0 = arith.constant 0 : i32
    %c0_i32_1 = arith.constant 0 : i32
    return %arg0, %c0_i32, %c0_i32_0 : i32, i32, i32
  }
  func.func @transform_16(%arg0: i32) -> (i32, i32, i32) {
    %c0_i32 = arith.constant 0 : i32
    %c0_i32_0 = arith.constant 0 : i32
    %c0_i32_1 = arith.constant 0 : i32
    return %arg0, %c0_i32, %c0_i32_0 : i32, i32, i32
  }
  func.func @transform_17(%arg0: i32) -> (i32, i32) {
    %c0_i32 = arith.constant 0 : i32
    %c0_i32_0 = arith.constant 0 : i32
    %c0_i32_1 = arith.constant 0 : i32
    return %c0_i32, %c0_i32_0 : i32, i32
  }
}

</mosaic_0001>

<bundles_post_ra>
// kernel: _run_reverse_diffusion.1
= control target key start
LH: loop header
LB: loop body
LE: loop exit
PB: predicated region body
PF: predicated region fallthrough
CT: control target
= control target key end

     0   :  { %s4058_s0 = inlined_call_operand.hbm [shape: f32[4,4], index: 0, kind: input, shape index: {}]   ;;  %s4059_s1 = inlined_call_operand.<no memory space> [shape: f32[1], index: 1, kind: input, shape index: {}]   ;;  %s4060_s2 = inlined_call_operand.hbm [shape: f32[128,128], index: 2, kind: input, shape index: {}]   ;;  %s4061_s3 = inlined_call_operand.hbm [shape: bf16[128,128], index: 3, kind: input, shape index: {}]   ;;  %s4062_s4 = inlined_call_operand.hbm [shape: f32[128,128], index: 4, kind: input, shape index: {}]   ;;  %s4063_s5 = inlined_call_operand.hbm [shape: bf16[128,128], index: 5, kind: input, shape index: {}]   ;;  %s4064_s6 = inlined_call_operand.vmem [shape: f32[1,128], index: 6, kind: input, shape index: {}]   ;;  %s4065_s7 = inlined_call_operand.hbm [shape: bf16[128,128], index: 7, kind: input, shape index: {}]   ;;  %s4066_s8 = inlined_call_operand.hbm [shape: bf16[128,128], index: 8, kind: input, shape index: {}]   ;;  %s4067_s9 = inlined_call_operand.vmem [shape: f32[1,128], index: 9, kind: input, shape index: {}]   ;;  %s4068_s10 = inlined_call_operand.vmem [shape: f32[1,128], index: 10, kind: input, shape index: {}]   ;;  %s4069_s11 = inlined_call_operand.hbm [shape: f32[128,128], index: 11, kind: input, shape index: {}]   ;;  %s4070_s12 = inlined_call_operand.vmem [shape: f32[1,128], index: 12, kind: input, shape index: {}]   ;;  %s4071_s13 = inlined_call_operand.hbm [shape: bf16[128,128], index: 13, kind: input, shape index: {}]   ;;  %s4072_s14 = inlined_call_operand.vmem [shape: f32[1,128], index: 14, kind: input, shape index: {}]   ;;  %s4073_s15 = inlined_call_operand.hbm [shape: f32[4,128,128], index: 15, kind: input, shape index: {}]   ;;  %s4074_s16 = inlined_call_operand.hbm [shape: f32[4,128,128], index: 16, kind: output, shape index: {0}]   ;;  %s4075_s17 = inlined_call_operand.hbm [shape: f32[128,128], index: 17, kind: output, shape index: {1}]  }
   0x1   :  { %4082 = sst [smem:[#allocation35_spill]] %s4058_s0 }
   0x2   :  { %4083 = sst [smem:[#allocation36_spill]] %s4059_s1 }
   0x3   :  { %4084 = sst [smem:[#allocation37_spill]] %s4060_s2 }
   0x4   :  { %4085 = sst [smem:[#allocation38_spill]] %s4061_s3 }
   0x5   :  { %4086 = sst [smem:[#allocation39_spill]] %s4062_s4 }
   0x6   :  { %4087 = sst [smem:[#allocation40_spill]] %s4063_s5 }
   0x7   :  { %4088 = sst [smem:[#allocation41_spill]] %s4065_s7 }
   0x8   :  { %4089 = sst [smem:[#allocation42_spill]] %s4066_s8 }
   0x9   :  { %4090 = sst [smem:[#allocation43_spill]] %s4069_s11 }
   0xa   :  { %4091 = sst [smem:[#allocation44_spill]] %s4070_s12 }
   0xb   :  { %4092 = sst [smem:[#allocation45_spill]] %s4071_s13 }
   0xc   :  { %4093 = sst [smem:[#allocation46_spill]] %s4072_s14 }
   0xd   :  { %4094 = sst [smem:[#allocation47_spill]] %s4074_s16 }
   0xe   :  { %4095 = sst [smem:[#allocation48_spill]] %s4075_s17 }
   0xf   :  { %s4096_s26 = sld [smem:[#allocation36_spill]] }
  0x15   :  { %23 = sst [smem:[#allocation4]] %s4096_s26 }
  0x16   :  { %24 = vsyncpa [#allocation8], 0 }
  0x17   :  { %25 = vsyncpa [#allocation6], 0 }
  0x18   :  { %26 = vsyncpa [#allocation11], 0 }
  0x19   :  { %27 = vsyncpa [#allocation14], 0 }
  0x1a   :  { %28 = vsyncpa [#allocation17], 0 }
  0x1b   :  { %29 = vsyncpa [#allocation20], 0 }
  0x1c   :  { %30 = vsyncpa [#allocation7], 0 }
  0x1d   :  { %32 = vsyncpa [#allocation7 + $0x1], 0 }
  0x1e   :  { %33 = vsyncpa [#allocation24], 0  ;;  %s3373_s27 = smov 0   ;;  %s3375_s28 = smov 0  }
  0x1f   :  { %s3377_s29 = smov 0   ;;  %s3379_s0 = smov 0  }
  0x20 LB: > { %s4097_s2 = sld [smem:[#allocation37_spill]]  ;;  %s3397_s1 = sadd.s32 4294967295, %s3262_s0   ;;  %s3262_s0 = sphi %s3379_s0, %s4128_s0   ;;  %s3258_s29 = sphi %s3377_s29, %s4127_s29   ;;  %s3254_s28 = sphi %s3375_s28, %s4126_s28   ;;  %s3250_s27 = sphi %s3373_s27, %s4125_s27  }
  0x21   : > { %p2311_p0 = scmp.ge.s32.totalorder %s3262_s0, 1  ;;  %p375_p1 = scmp.eq.s32.totalorder %s3397_s1, 0 }
  0x22   : > { %p432_p2 = scmp.lt.s32.totalorder %s3262_s0, 5  ;;  %s3264_s21 = smov [#allocation9]  }
  0x23   : > { %s458_s22 = sshll.u32 %s3264_s21, 4  ;;  %s4099_s3 = sld [smem:[#allocation38_spill]]  ;;  %s459_s22 = int_to_ptr.vmem [resolvable:$true] %s458_s22 }
  0x24   : > { %p3403_p4 = pnand %p2311_p0, %p432_p2  ;;  %s3265_s30 = smov [#allocation10]  }
  0x25   : > { %s472_s18 = sshll.u32 %s3265_s30, 4  ;;  %s4079_s21 = smov 8   ;;  %s473_s18 = int_to_ptr.vmem [resolvable:$true] %s472_s18 }
  0x26   : > { %s456_s19 = sshll.u32 %s4097_s2, 4  ;;  %p2681_p5 = pneg %p3403_p4  ;;  %s457_s19 = int_to_ptr.hbm [resolvable:$true] %s456_s19 }
  0x27   : > { %s4077_s2 = smov 128   ;;  %s3268_s23 = smov 64  }
  0x28   : > { %p3414_p6 = pnand %p2681_p5, %p375_p1  ;;  %s3269_s24 = smov 4  }
  0x29   : > { %s470_s25 = sshll.u32 %s4099_s3, 4  ;;  %s4101_s5 = sld [smem:[#allocation40_spill]]  ;;  %s471_s25 = int_to_ptr.hbm [resolvable:$true] %s470_s25 }
  0x2a   : > { %2687 = dma.hbm_to_vmem [thread:$0]  (!%p3414_p6), %s457_s19, 2048, %s459_s22, [#allocation6], %s4077_s2, %s4077_s2, %s4079_s21  }
  0x2b   : > { %2690 = dma.hbm_to_vmem [thread:$0]  (!%p3414_p6), %s471_s25, 1024, %s473_s18, [#allocation11], %s3268_s23, %s3268_s23, %s3269_s24  }
  0x2c   : > { %s3270_s16 = smov [#allocation13]   ;;  %s4102_s8 = sld [smem:[#allocation42_spill]] }
  0x2d   : > { %s500_s14 = sshll.u32 %s3270_s16, 4  ;;  %s3271_s25 = smov [#allocation16]   ;;  %s501_s14 = int_to_ptr.vmem [resolvable:$true] %s500_s14 }
  0x2e   : > { %s531_s18 = sshll.u32 %s3271_s25, 4  ;;  %s4103_s2 = sld [smem:[#allocation35_spill]]  ;;  %s532_s18 = int_to_ptr.vmem [resolvable:$true] %s531_s18 }
  0x2f   : > { %s498_s30 = sshll.u32 %s4101_s5, 4  ;;  %s4104_s4 = sld [smem:[#allocation39_spill]]  ;;  %s499_s30 = int_to_ptr.hbm [resolvable:$true] %s498_s30 }
  0x30   : > { %2696 = dma.hbm_to_vmem [thread:$0]  (!%p3414_p6), %s499_s30, 1024, %s501_s14, [#allocation14], %s3268_s23, %s3268_s23, %s3269_s24  }
  0x31   : > { %s3272_s30 = smov [#allocation5]   ;;  %s3273_s19 = smov [#allocation12]  }
  0x32   : > { %s529_s22 = sshll.u32 %s4102_s8, 4  ;;  %s486_s25 = sshll.u32 %s3273_s19, 4  ;;  %s530_s22 = int_to_ptr.hbm [resolvable:$true] %s529_s22  ;;  %s487_s25 = int_to_ptr.vmem [resolvable:$true] %s486_s25 }
  0x33   : > { %2702 = dma.hbm_to_vmem [thread:$0]  (!%p3414_p6), %s530_s22, 1024, %s532_s18, [#allocation17], %s3268_s23, %s3268_s23, %s3269_s24  }
  0x34   : > { %s444_s21 = sshll.u32 %s4103_s2, 4  ;;  %s4105_s7 = sld [smem:[#allocation41_spill]]  ;;  %s445_s21 = int_to_ptr.hbm [resolvable:$true] %s444_s21 }
  0x35   : > { %s484_s14 = sshll.u32 %s4104_s4, 4  ;;  %s4106_s22 = smov 8   ;;  %s485_s14 = int_to_ptr.hbm [resolvable:$true] %s484_s14 }
  0x36   : > { %2684 = dma.hbm_to_smem (!%p3414_p6), %s445_s21, 64, %s3272_s30, [#allocation8]  }
  0x37   : > { %s4107_s18 = smov 128   ;;  %s4108_s11 = sld [smem:[#allocation43_spill]] }
  0x38   : > { %2693 = dma.hbm_to_vmem [thread:$0]  (!%p3414_p6), %s485_s14, 2048, %s487_s25, [#allocation11], %s4107_s18, %s4107_s18, %s4106_s22  }
  0x39   : > { %s3274_s30 = smov [#allocation15]   ;;  %s3275_s14 = smov [#allocation18]  }
  0x3a   : > { %s515_s17 = sshll.u32 %s4105_s7, 4  ;;  %s517_s19 = sshll.u32 %s3274_s30, 4  ;;  %s516_s17 = int_to_ptr.hbm [resolvable:$true] %s515_s17  ;;  %s518_s19 = int_to_ptr.vmem [resolvable:$true] %s517_s19 }
  0x3b   : > { %2699 = dma.hbm_to_vmem [thread:$0]  (!%p3414_p6), %s516_s17, 1024, %s518_s19, [#allocation14], %s3268_s23, %s3268_s23, %s3269_s24  }
  0x3c   : > { %s551_s25 = sshll.u32 %s3275_s14, 4  ;;  %s4109_s13 = sld [smem:[#allocation45_spill]]  ;;  %s552_s25 = int_to_ptr.vmem [resolvable:$true] %s551_s25 }
  0x3d   : > { %s549_s21 = sshll.u32 %s4108_s11, 4  ;;  %s3276_s17 = smov [#allocation19]   ;;  %s550_s21 = int_to_ptr.hbm [resolvable:$true] %s549_s21 }
  0x3e   : > { %2705 = dma.hbm_to_vmem [thread:$0]  (!%p3414_p6), %s550_s21, 2048, %s552_s25, [#allocation17], %s4107_s18, %s4107_s18, %s4106_s22  }
  0x3f   : > { %s568_s16 = sshll.u32 %s3276_s17, 4  ;;  %s2310_s30 = sadd.s32 4294967294, %s3262_s0   ;;  %s569_s16 = int_to_ptr.vmem [resolvable:$true] %s568_s16 }
  0x40   : > { %s3483_s19 = sadd.s32 1, %s3262_s0   ;;  %s361_s14 = sadd.s32 1, %s3258_s29 }
  0x41   : > { %s358_s21 = ssub.s32 %s3262_s0, %s3483_s19  ;;  %p368_p7 = scmp.ne.s32.totalorder %s3258_s29, %s3254_s28 }
  0x42   : > { %s566_s12 = sshll.u32 %s4109_s13, 4  ;;  %p359_p8 = scmp.eq.s32.totalorder %s358_s21, 0  ;;  %s567_s12 = int_to_ptr.hbm [resolvable:$true] %s566_s12 }
  0x43   : > { %2708 = dma.hbm_to_vmem [thread:$0]  (!%p3414_p6), %s567_s12, 1024, %s569_s16, [#allocation20], %s3268_s23, %s3268_s23, %s3269_s24  }
  0x44   : > { %p369_p9 = scmp.eq.s32.totalorder %s3262_s0, 0  ;;  %p374_p10 = scmp.ne.s32.totalorder %s3254_s28, %s3250_s27 }
  0x45   : > { %p4081_p11 = scmp.eq.s32.totalorder %s3397_s1, 3  ;;  %p404_p2 = scmp.eq.s32.totalorder %s2310_s30, 3 }
  0x46   : > { %s3495_s26 = scalar_select %p359_p8, %s3258_s29, %s361_s14  }
  0x47   : > { %p3497_p12 = por %p369_p9, %p368_p7  ;;  %p3503_p13 = por %p375_p1, %p374_p10 }
  0x48   : > { %4110 = sst [smem:[#allocation34_spill]] %s3495_s26  ;;  %p3509_p0 = por %p4081_p11, %p368_p7 }
  0x49   : > { %p2726_p5 = scmp.lt.s32.totalorder %s3262_s0, 4  ;;  %s585_s3 = sand.u32 1, %s3262_s0  }
  0x4a   : > { %p3515_p6 = por %p404_p2, %p374_p10  ;;  %s587_s12 = sand.u32 1, %s3258_s29  }
  0x4b   : > { %s2539_s17 = sshll.u32 %s3262_s0, 7  ;;  %s2322_s16 = sshll.u32 %s587_s12, 7 }
  0x4c   : > { %s594_s4 = scalar_lea.hbm %s4073_s15, %s2539_s17  ;;  %s589_s7 = scalar_lea.vmem [#allocation21], %s2322_s16 }
  0x4d   : > { %s595_s5 = sshll.u32 %s594_s4, 4  ;;  %s597_s8 = sshll.u32 %s589_s7, 4  ;;  %s596_s5 = int_to_ptr.hbm [resolvable:$true] %s595_s5  ;;  %s598_s8 = int_to_ptr.vmem [resolvable:$true] %s597_s8 }
  0x4e   : > { %p3526_p7 = pnand %p2726_p5, %p3497_p12  ;;  %s586_s11 = scalar_lea.sflag [#allocation6], %s585_s3 }
  0x4f   : > { %s3110_s13 = sshra.s32 %s596_s5, 4  ;;  %s3117_s7 = scalar_lea.hbm %s4073_s15, 512  ;;  %s3111_s13 = int_to_ptr.hbm [resolvable:$true] %s3110_s13 }
  0x50   : > { %s3112_s26 = scalar_lea.hbm %s3111_s13, 128  ;;  %p3114_p9 = pneg %p3526_p7 }
  0x51   : > { %p3113_p8 = scmp.ne.s32.totalorder %s3111_s13, %s3112_s26  ;;  %p3118_p12 = scmp.lt.s32.totalorder %s3111_s13, %s4073_s15 }
  0x52   : > { %p3119_p5 = scmp.lt.s32.totalorder %s3117_s7, %s3112_s26 }
  0x53   : > { %p3115_p10 = pnand %p3114_p9, %p3113_p8 }
  0x54   : > { %p3120_p11 = por %p3119_p5, %p3118_p12 }
  0x55   : > { %p3116_p2 = pneg %p3115_p10 }
  0x57   : > { %p3121_p3 = pnand %p3120_p11, %p3116_p2 }
  0x59   : > { %3124 = shalt.err (!%p3121_p3)
}
  0x5a   : > { %2712 = dma.hbm_to_vmem [thread:$0]  (!%p3526_p7), %s596_s5, 2048, %s598_s8, %s586_s11, %s4107_s18, %s4107_s18, %s4106_s22  }
  0x5b   : > { %609 = sbr.rel (%p3403_p4) target bundleno = 1557 (0x615), region = 84 }
  0x60   : > { %3213 = dma.done.wait (%p375_p1), [#allocation8], 64  }
  0x61   : > { %3215 = vsyncadd (%p375_p1), [#allocation8], 4294967232 }
  0x62   : > { %3217 = dma.done.wait (%p375_p1), [#allocation6], 2048  }
  0x63   : > { %3219 = vsyncadd (%p375_p1), [#allocation6], 4294965248 }
  0x64   : > { %3221 = dma.done.wait (%p375_p1), [#allocation11], 3072  }
  0x65   : > { %3223 = vsyncadd (%p375_p1), [#allocation11], 4294964224 }
  0x66   : > { %3225 = dma.done.wait (%p375_p1), [#allocation14], 2048  }
  0x67   : > { %3227 = vsyncadd (%p375_p1), [#allocation14], 4294965248 }
  0x68   : > { %3229 = dma.done.wait (%p375_p1), [#allocation17], 3072  }
  0x69   : > { %3231 = vsyncadd (%p375_p1), [#allocation17], 4294964224 }
  0x6a   : > { %3233 = dma.done.wait (%p375_p1), [#allocation20], 1024  }
  0x6b   : > { %3235 = vsyncadd (%p375_p1), [#allocation20], 4294966272  ;;  %s656_s5 = sand.u32 1, %s3397_s1   ;;  %s658_s8 = sand.u32 1, %s3254_s28  }
  0x6c   : > { %s2335_s11 = sshll.u32 %s658_s8, 7  ;;  %s657_s13 = scalar_lea.sflag [#allocation6], %s656_s5 }
  0x6d   : > { %s3573_s20 = scalar_lea.vmem [#allocation21], %s2335_s11 }
  0x6e   : > { %3237 = dma.done.wait (%p3503_p13), %s657_s13, 2048  }
  0x6f   : > { %3239 = vsyncadd (%p3503_p13), %s657_s13, 4294965248 }
  0x70   : > { %666 = sfence }
  0x71   : > { %s3579_s22 = scalar_lea.vmem [#allocation22], %s2335_s11  ;;  %p4116_p1 = scmp.ne.s32.totalorder %s3397_s1, 0 }
  0x73   : > { %716 = sbr.rel (%p4116_p1) target bundleno = 316 (0x13c), region = 128 }
  0x78   : > { %v717_v0 = vld [vmem:[#allocation9] sm:$0xff]  ;;  %v718_v1 = vld [vmem:[#allocation9 + $0x8] sm:$0xff]  ;;  %v719_v2 = vld [vmem:[#allocation9 + $0x10] sm:$0xff] }
  0x79   : > { %v720_v3 = vld [vmem:[#allocation9 + $0x18] sm:$0xff]  ;;  %733 = vst [vmem:[#allocation2 + $0x30] sm:$0xff] %v717_v0  ;;  %v721_v4 = vld [vmem:[#allocation9 + $0x20] sm:$0xff]  ;;  %v722_v5 = vld [vmem:[#allocation9 + $0x28] sm:$0xff] }
  0x7a   : > { %734 = vst [vmem:[#allocation2] sm:$0xff] %v718_v1  ;;  %v723_v6 = vld [vmem:[#allocation9 + $0x30] sm:$0xff]  ;;  %v724_v7 = vld [vmem:[#allocation9 + $0x38] sm:$0xff]  ;;  %v725_v9 = vld [vmem:[#allocation9 + $0x40] sm:$0xff] }
  0x7b   : > { %735 = vst [vmem:[#allocation2 + $0x58] sm:$0xff] %v719_v2  ;;  %v2555_v8 = vld [vmem:[#allocation15 + $0x38] sm:$0xff]  ;;  %v726_v10 = vld [vmem:[#allocation9 + $0x48] sm:$0xff]  ;;  %v2554_v11 = vld [vmem:[#allocation15 + $0x30] sm:$0xff] }
  0x7c   : > { %736 = vst [vmem:[#allocation2 + $0x18] sm:$0xff] %v720_v3  ;;  %881 = vmatpush.bf16.msra.mxu0 %v2555_v8  ;;  %2589 = vmatpush.bf16.msra.mxu1 %v2555_v8  ;;  %v727_v12 = vld [vmem:[#allocation9 + $0x50] sm:$0xff]  ;;  %v728_v13 = vld [vmem:[#allocation9 + $0x58] sm:$0xff]  ;;  %v729_v14 = vld [vmem:[#allocation9 + $0x60] sm:$0xff] }
  0x7d   : > { %737 = vst [vmem:[#allocation2 + $0x50] sm:$0xff] %v721_v4  ;;  %2590 = vmatpush.bf16.msra.mxu2 %v2555_v8  ;;  %2591 = vmatpush.bf16.msra.mxu3 %v2555_v8  ;;  %v730_v15 = vld [vmem:[#allocation9 + $0x68] sm:$0xff]  ;;  %v731_v17 = vld [vmem:[#allocation9 + $0x70] sm:$0xff]  ;;  %v732_v18 = vld [vmem:[#allocation9 + $0x78] sm:$0xff] }
  0x7e   : > { %738 = vst [vmem:[#allocation2 + $0x68] sm:$0xff] %v722_v5  ;;  %v2553_v16 = vld [vmem:[#allocation15 + $0x28] sm:$0xff]  ;;  %v2552_v19 = vld [vmem:[#allocation15 + $0x20] sm:$0xff]  ;;  %v2551_v20 = vld [vmem:[#allocation15 + $0x18] sm:$0xff] }
  0x7f   : > { %739 = vst [vmem:[#allocation2 + $0x8] sm:$0xff] %v723_v6  ;;  %v2550_v21 = vld [vmem:[#allocation15 + $0x10] sm:$0xff]  ;;  %v2549_v22 = vld [vmem:[#allocation15 + $0x8] sm:$0xff]  ;;  %v2548_v23 = vld [vmem:[#allocation15] sm:$0xff] }
  0x80   : > { %740 = vst [vmem:[#allocation2 + $0x48] sm:$0xff] %v724_v7  ;;  %882 = vmatpush.bf16.msra.mxu0 %v2554_v11  ;;  %2592 = vmatpush.bf16.msra.mxu1 %v2554_v11  ;;  %v2540_v24 = vld [vmem:[#allocation10] sm:$0xff]  ;;  %v2542_v25 = vld [vmem:[#allocation10 + $0x10] sm:$0xff]  ;;  %v2541_v28 = vld [vmem:[#allocation10 + $0x8] sm:$0xff] }
  0x81   : > { %741 = vst [vmem:[#allocation2 + $0x40] sm:$0xff] %v725_v9  ;;  %2593 = vmatpush.bf16.msra.mxu2 %v2554_v11  ;;  %2594 = vmatpush.bf16.msra.mxu3 %v2554_v11  ;;  %v2544_v26 = vld [vmem:[#allocation10 + $0x20] sm:$0xff]  ;;  %v2546_v27 = vld [vmem:[#allocation10 + $0x30] sm:$0xff]  ;;  %v2543_v29 = vld [vmem:[#allocation10 + $0x18] sm:$0xff] }
  0x82   : > { %742 = vst [vmem:[#allocation2 + $0x20] sm:$0xff] %v726_v10  ;;  %v2545_v30 = vld [vmem:[#allocation10 + $0x28] sm:$0xff]  ;;  %v2547_v31 = vld [vmem:[#allocation10 + $0x38] sm:$0xff]  ;;  %v2787_v32 = vld [vmem:[%s4067_s9] ss:$0 sm:$0xff] }
  0x83   : > { %743 = vst [vmem:[#allocation2 + $0x10] sm:$0xff] %v727_v12 }
  0x84   : > { %744 = vst [vmem:[#allocation2 + $0x38] sm:$0xff] %v728_v13  ;;  %883 = vmatpush.bf16.msra.mxu0 %v2553_v16  ;;  %2595 = vmatpush.bf16.msra.mxu1 %v2553_v16 }
  0x85   : > { %745 = vst [vmem:[#allocation2 + $0x60] sm:$0xff] %v729_v14  ;;  %2596 = vmatpush.bf16.msra.mxu2 %v2553_v16  ;;  %2597 = vmatpush.bf16.msra.mxu3 %v2553_v16 }
  0x86   : > { %746 = vst [vmem:[#allocation2 + $0x70] sm:$0xff] %v730_v15 }
  0x87   : > { %747 = vst [vmem:[#allocation2 + $0x78] sm:$0xff] %v731_v17 }
  0x88   : > { %748 = vst [vmem:[#allocation2 + $0x28] sm:$0xff] %v732_v18  ;;  %884 = vmatpush.bf16.msra.mxu0 %v2552_v19  ;;  %2598 = vmatpush.bf16.msra.mxu1 %v2552_v19 }
  0x89   : > { %2599 = vmatpush.bf16.msra.mxu2 %v2552_v19  ;;  %2600 = vmatpush.bf16.msra.mxu3 %v2552_v19 }
  0x8c   : > { %885 = vmatpush.bf16.msra.mxu0 %v2551_v20  ;;  %2601 = vmatpush.bf16.msra.mxu1 %v2551_v20 }
  0x8d   : > { %2602 = vmatpush.bf16.msra.mxu2 %v2551_v20  ;;  %2603 = vmatpush.bf16.msra.mxu3 %v2551_v20 }
  0x90   : > { %886 = vmatpush.bf16.msra.mxu0 %v2550_v21  ;;  %2604 = vmatpush.bf16.msra.mxu1 %v2550_v21 }
  0x91   : > { %2605 = vmatpush.bf16.msra.mxu2 %v2550_v21  ;;  %2606 = vmatpush.bf16.msra.mxu3 %v2550_v21 }
  0x94   : > { %887 = vmatpush.bf16.msra.mxu0 %v2549_v22  ;;  %2607 = vmatpush.bf16.msra.mxu1 %v2549_v22 }
  0x95   : > { %2608 = vmatpush.bf16.msra.mxu2 %v2549_v22  ;;  %2609 = vmatpush.bf16.msra.mxu3 %v2549_v22 }
  0x98   : > { %888 = vmatpush.bf16.msra.mxu0 %v2548_v23  ;;  %2610 = vmatpush.bf16.msra.mxu1 %v2548_v23 }
  0x99   : > { %2611 = vmatpush.bf16.msra.mxu2 %v2548_v23  ;;  %2612 = vmatpush.bf16.msra.mxu3 %v2548_v23 }
  0x9b   : > { %889 = vmatmul.bf16.vlgmr.msra.gmra.mxu0 %v2540_v24  ;;  %899 = vmatmul.bf16.vlgmr.msra.gmra.mxu1 %v2542_v25 }
  0x9c   : > { %909 = vmatmul.bf16.vlgmr.msra.gmra.mxu2 %v2544_v26  ;;  %919 = vmatmul.bf16.vlgmr.msra.gmra.mxu3 %v2546_v27 }
  0xab   : > { %894 = vmatmul.bf16.gmra.mxu0 %v2541_v28  ;;  %904 = vmatmul.bf16.gmra.mxu1 %v2543_v29 }
  0xac   : > { %914 = vmatmul.bf16.gmra.mxu2 %v2545_v30  ;;  %924 = vmatmul.bf16.gmra.mxu3 %v2547_v31 }
 0x118   : > { %v890_v33 = vpop.f32.mrf.mxu0  ;;  %v900_v34 = vpop.f32.mrf.mxu1 }
 0x119   : > { %v891_v35 = vadd.f32 %v2787_v32, %v890_v33  ;;  %v901_v36 = vadd.f32 %v2787_v32, %v900_v34 }
 0x11b   : > { %930 = vst [vmem:[#allocation3 + $0x28] sm:$0xff] %v891_v35 }
 0x11c   : > { %934 = vst [vmem:[#allocation3 + $0x48] sm:$0xff] %v901_v36 }
 0x11f   : > { %v910_v37 = vpop.f32.mrf.mxu2  ;;  %v920_v38 = vpop.f32.mrf.mxu3 }
 0x120   : > { %v911_v39 = vadd.f32 %v2787_v32, %v910_v37  ;;  %v921_v40 = vadd.f32 %v2787_v32, %v920_v38  ;;  %v892_v41 = vpop.f32.mrf.mxu0  ;;  %v902_v42 = vpop.f32.mrf.mxu1 }
 0x121   : > { %v893_v43 = vadd.f32 %v2787_v32, %v892_v41  ;;  %v903_v44 = vadd.f32 %v2787_v32, %v902_v42 }
 0x122   : > { %938 = vst [vmem:[#allocation3 + $0x20] sm:$0xff] %v911_v39 }
 0x123   : > { %942 = vst [vmem:[#allocation3] sm:$0xff] %v921_v40 }
 0x124   : > { %931 = vst [vmem:[#allocation3 + $0x68] sm:$0xff] %v893_v43 }
 0x125   : > { %935 = vst [vmem:[#allocation3 + $0x30] sm:$0xff] %v903_v44 }
 0x127   : > { %v912_v45 = vpop.f32.mrf.mxu2  ;;  %v922_v46 = vpop.f32.mrf.mxu3 }
 0x128   : > { %v913_v47 = vadd.f32 %v2787_v32, %v912_v45  ;;  %v923_v48 = vadd.f32 %v2787_v32, %v922_v46  ;;  %v895_v49 = vpop.f32.mrf.mxu0  ;;  %v905_v50 = vpop.f32.mrf.mxu1 }
 0x129   : > { %v896_v51 = vadd.f32 %v2787_v32, %v895_v49  ;;  %v906_v52 = vadd.f32 %v2787_v32, %v905_v50 }
 0x12a   : > { %939 = vst [vmem:[#allocation3 + $0x78] sm:$0xff] %v913_v47 }
 0x12b   : > { %943 = vst [vmem:[#allocation3 + $0x8] sm:$0xff] %v923_v48 }
 0x12c   : > { %932 = vst [vmem:[#allocation3 + $0x10] sm:$0xff] %v896_v51 }
 0x12d   : > { %936 = vst [vmem:[#allocation3 + $0x70] sm:$0xff] %v906_v52 }
 0x12f   : > { %v915_v53 = vpop.f32.mrf.mxu2  ;;  %v925_v54 = vpop.f32.mrf.mxu3 }
 0x130   : > { %v916_v55 = vadd.f32 %v2787_v32, %v915_v53  ;;  %v926_v56 = vadd.f32 %v2787_v32, %v925_v54  ;;  %v897_v57 = vpop.f32.mrf.mxu0  ;;  %v907_v58 = vpop.f32.mrf.mxu1 }
 0x131   : > { %v898_v59 = vadd.f32 %v2787_v32, %v897_v57  ;;  %v908_v60 = vadd.f32 %v2787_v32, %v907_v58 }
 0x132   : > { %940 = vst [vmem:[#allocation3 + $0x18] sm:$0xff] %v916_v55 }
 0x133   : > { %944 = vst [vmem:[#allocation3 + $0x60] sm:$0xff] %v926_v56 }
 0x134   : > { %933 = vst [vmem:[#allocation3 + $0x40] sm:$0xff] %v898_v59 }
 0x135   : > { %937 = vst [vmem:[#allocation3 + $0x38] sm:$0xff] %v908_v60 }
 0x137   : > { %v917_v61 = vpop.f32.mrf.mxu2  ;;  %v927_v62 = vpop.f32.mrf.mxu3 }
 0x138   : > { %v918_v63 = vadd.f32 %v2787_v32, %v917_v61  ;;  %v928_v0 = vadd.f32 %v2787_v32, %v927_v62 }
 0x13a   : > { %941 = vst [vmem:[#allocation3 + $0x58] sm:$0xff] %v918_v63 }
 0x13b   : > { %945 = vst [vmem:[#allocation3 + $0x50] sm:$0xff] %v928_v0 }
 0x13c PF: > { %s3587_s23 = sshll.u32 %s3397_s1, 7  ;;  %v970_v1 = vld [vmem:[#allocation2 + $0x28] sm:$0xff]  ;;  %v986_v2 = vld [vmem:[%s3573_s20 + $0x78] sm:$0xff]  ;;  %v985_v3 = vld [vmem:[%s3573_s20 + $0x70] sm:$0xff]  ;;  %s954_s21 = sld [smem:[#allocation4]] }
 0x13d   : > { %s947_s3 = sld [smem:[#allocation5 + %s3587_s23]]  ;;  %s950_s16 = sadd.s32 2, %s3587_s23  ;;  %v984_v4 = vld [vmem:[%s3573_s20 + $0x68] sm:$0xff]  ;;  %v983_v5 = vld [vmem:[%s3573_s20 + $0x60] sm:$0xff]  ;;  %v982_v6 = vld [vmem:[%s3573_s20 + $0x58] sm:$0xff] }
 0x13e   : > { %s951_s14 = sld [smem:[#allocation5 + %s950_s16]]  ;;  %v981_v7 = vld [vmem:[%s3573_s20 + $0x50] sm:$0xff]  ;;  %v969_v9 = vld [vmem:[#allocation2 + $0x78] sm:$0xff]  ;;  %v967_v11 = vld [vmem:[#allocation2 + $0x60] sm:$0xff]  ;;  %s952_s7 = sadd.s32 3, %s3587_s23 }
 0x13f   : > { %v968_v10 = vld [vmem:[#allocation2 + $0x70] sm:$0xff]  ;;  %v966_v15 = vld [vmem:[#allocation2 + $0x38] sm:$0xff]  ;;  %v980_v17 = vld [vmem:[%s3573_s20 + $0x48] sm:$0xff]  ;;  %s953_s17 = sld [smem:[#allocation5 + %s952_s7]]  ;;  %s948_s11 = sadd.s32 1, %s3587_s23 }
 0x140   : > { %v965_v16 = vld [vmem:[#allocation2 + $0x10] sm:$0xff]  ;;  %v964_v25 = vld [vmem:[#allocation2 + $0x20] sm:$0xff]  ;;  %v978_v42 = vld [vmem:[%s3573_s20 + $0x38] sm:$0xff]  ;;  %s949_s13 = sld [smem:[#allocation5 + %s948_s11]]  ;;  %p2467_p3 = scmp.ne.s32.totalorder %s3397_s1, 3 }
 0x141   : > { %v979_v30 = vld [vmem:[%s3573_s20 + $0x40] sm:$0xff]  ;;  %v977_v44 = vld [vmem:[%s3573_s20 + $0x30] sm:$0xff]  ;;  %v962_v46 = vld [vmem:[#allocation2 + $0x48] sm:$0xff]  ;;  %s4117_s26 = sld [smem:[#allocation44_spill]] }
 0x142   : > { %v963_v38 = vld [vmem:[#allocation2 + $0x40] sm:$0xff]  ;;  %v976_v47 = vld [vmem:[%s3573_s20 + $0x28] sm:$0xff]  ;;  %v974_v54 = vld [vmem:[%s3573_s20 + $0x18] sm:$0xff]  ;;  %s1361_s12 = ssub.f32 0.0, %s954_s21 }
 0x143   : > { %v3597_v8 = vstv %s947_s3  ;;  %v961_v49 = vld [vmem:[#allocation2 + $0x8] sm:$0xff]  ;;  %v975_v50 = vld [vmem:[%s3573_s20 + $0x20] sm:$0xff]  ;;  %v959_v57 = vld [vmem:[#allocation2 + $0x50] sm:$0xff] }
 0x144   : > { %v1003_v12 = vmul.f32 %v3597_v8, %v986_v2  ;;  %v1002_v13 = vmul.f32 %v3597_v8, %v985_v3  ;;  %v1001_v14 = vmul.f32 %v3597_v8, %v984_v4  ;;  %v1000_v18 = vmul.f32 %v3597_v8, %v983_v5  ;;  %v960_v53 = vld [vmem:[#allocation2 + $0x68] sm:$0xff]  ;;  %v973_v58 = vld [vmem:[%s3573_s20 + $0x10] sm:$0xff]  ;;  %v958_v61 = vld [vmem:[#allocation2 + $0x18] sm:$0xff] }
 0x145   : > { %v999_v19 = vmul.f32 %v3597_v8, %v982_v6  ;;  %v998_v20 = vmul.f32 %v3597_v8, %v981_v7  ;;  %v3606_v22 = vstv %s951_s14  ;;  %v997_v29 = vmul.f32 %v3597_v8, %v980_v17  ;;  %v972_v62 = vld [vmem:[%s3573_s20 + $0x8] sm:$0xff]  ;;  %v971_v2 = vld [vmem:[%s3573_s20] sm:$0xff]  ;;  %v1026_v17 = vld [vmem:[#allocation12 + $0x30] sm:$0xff]  ;;  %s4118_s14 = sld [smem:[#allocation46_spill]] (!%p2467_p3) }
 0x146   : > { %v1019_v21 = vadd.f32 %v1003_v12, %v970_v1  ;;  %v1018_v23 = vadd.f32 %v1002_v13, %v969_v9  ;;  %v1017_v24 = vadd.f32 %v1001_v14, %v968_v10  ;;  %v1016_v26 = vadd.f32 %v1000_v18, %v967_v11  ;;  %v957_v1 = vld [vmem:[#allocation2 + $0x58] sm:$0xff]  ;;  %v956_v5 = vld [vmem:[#allocation2] sm:$0xff]  ;;  %v955_v9 = vld [vmem:[#allocation2 + $0x30] sm:$0xff] }
 0x147   : > { %v1015_v27 = vadd.f32 %v999_v19, %v966_v15  ;;  %v1014_v28 = vadd.f32 %v998_v20, %v965_v16  ;;  %v1013_v37 = vadd.f32 %v997_v29, %v964_v25  ;;  %v996_v39 = vmul.f32 %v3597_v8, %v979_v30  ;;  %v1020_v12 = vld [vmem:[#allocation12] sm:$0xff]  ;;  %v1021_v13 = vld [vmem:[#allocation12 + $0x8] sm:$0xff]  ;;  %v1022_v14 = vld [vmem:[#allocation12 + $0x10] sm:$0xff] }
 0x148   : > { %1036 = vmatpush.msra.mxu0 %v1019_v21  ;;  %v3611_v31 = vmul.f32 %v3606_v22, %v1019_v21  ;;  %v3614_v32 = vmul.f32 %v3606_v22, %v1018_v23  ;;  %v3617_v33 = vmul.f32 %v3606_v22, %v1017_v24  ;;  %v3620_v34 = vmul.f32 %v3606_v22, %v1016_v26  ;;  %v1024_v15 = vld [vmem:[#allocation12 + $0x20] sm:$0xff]  ;;  %v1025_v16 = vld [vmem:[#allocation12 + $0x28] sm:$0xff]  ;;  %v1027_v18 = vld [vmem:[#allocation12 + $0x38] sm:$0xff] }
 0x149   : > { %v3623_v35 = vmul.f32 %v3606_v22, %v1015_v27  ;;  %v3626_v36 = vmul.f32 %v3606_v22, %v1014_v28  ;;  %v3630_v40 = vmul.f32 %v3606_v22, %v1013_v37  ;;  %v1012_v41 = vadd.f32 %v996_v39, %v963_v38  ;;  %v1028_v19 = vld [vmem:[#allocation12 + $0x40] sm:$0xff]  ;;  %v1029_v20 = vld [vmem:[#allocation12 + $0x48] sm:$0xff]  ;;  %v1030_v21 = vld [vmem:[#allocation12 + $0x50] sm:$0xff] }
 0x14a   : > { %1037 = vmatpush.msra.mxu0 %v1018_v23  ;;  %v995_v45 = vmul.f32 %v3597_v8, %v978_v42  ;;  %v994_v48 = vmul.f32 %v3597_v8, %v977_v44  ;;  %v993_v52 = vmul.f32 %v3597_v8, %v976_v47  ;;  %v992_v56 = vmul.f32 %v3597_v8, %v975_v50  ;;  %v1031_v23 = vld [vmem:[#allocation12 + $0x58] sm:$0xff]  ;;  %v1033_v25 = vld [vmem:[#allocation12 + $0x68] sm:$0xff] }
 0x14b   : > { %v3634_v43 = vmul.f32 %v3606_v22, %v1012_v41  ;;  %v991_v60 = vmul.f32 %v3597_v8, %v974_v54  ;;  %v990_v0 = vmul.f32 %v3597_v8, %v973_v58  ;;  %v989_v4 = vmul.f32 %v3597_v8, %v972_v62 }
 0x14c   : > { %1038 = vmatpush.msra.mxu0 %v1017_v24  ;;  %v3641_v51 = vadd.f32 %v995_v45, %v962_v46  ;;  %v3645_v55 = vadd.f32 %v994_v48, %v961_v49  ;;  %v3650_v59 = vadd.f32 %v993_v52, %v960_v53  ;;  %v3655_v63 = vadd.f32 %v992_v56, %v959_v57  ;;  %v1032_v24 = vld [vmem:[#allocation12 + $0x60] sm:$0xff] }
 0x14d   : > { %v3660_v3 = vadd.f32 %v991_v60, %v958_v61  ;;  %v3664_v6 = vadd.f32 %v990_v0, %v957_v1  ;;  %v988_v7 = vmul.f32 %v3597_v8, %v971_v2  ;;  %v3668_v10 = vadd.f32 %v989_v4, %v956_v5  ;;  %v1023_v8 = vld [vmem:[#allocation12 + $0x18] sm:$0xff] }
 0x14e   : > { %1039 = vmatpush.msra.mxu0 %v1016_v26  ;;  %v1034_v26 = vld [vmem:[#allocation12 + $0x70] sm:$0xff] }
 0x14f   : > { %v3671_v11 = vadd.f32 %v988_v7, %v955_v9 }
 0x150   : > { %1040 = vmatpush.msra.mxu0 %v1015_v27  ;;  %v1035_v27 = vld [vmem:[#allocation12 + $0x78] sm:$0xff] }
 0x152   : > { %1041 = vmatpush.msra.mxu0 %v1014_v28 }
 0x154   : > { %1042 = vmatpush.msra.mxu0 %v1013_v37 }
 0x156   : > { %1043 = vmatpush.msra.mxu0 %v1012_v41 }
 0x158   : > { %1044 = vmatpush.msra.mxu0 %v3641_v51 }
 0x15a   : > { %1045 = vmatpush.msra.mxu0 %v3645_v55 }
 0x15c   : > { %1046 = vmatpush.msra.mxu0 %v3650_v59 }
 0x15e   : > { %1047 = vmatpush.msra.mxu0 %v3655_v63 }
 0x160   : > { %1048 = vmatpush.msra.mxu0 %v3660_v3 }
 0x162   : > { %1049 = vmatpush.msra.mxu0 %v3664_v6 }
 0x164   : > { %1050 = vmatpush.msra.mxu0 %v3668_v10 }
 0x166   : > { %1051 = vmatpush.msra.mxu0 %v3671_v11 }
 0x167   : > { %1052 = vmatmul.f32.vlgmr.msra.gmra.mxu0 %v1020_v12 }
 0x16f   : > { %1055 = vmatmul.f32.gmra.mxu0 %v1021_v13 }
 0x177   : > { %1058 = vmatmul.f32.gmra.mxu0 %v1022_v14 }
 0x17f   : > { %1061 = vmatmul.f32.gmra.mxu0 %v1023_v8 }
 0x187   : > { %1064 = vmatmul.f32.gmra.mxu0 %v1024_v15 }
 0x18f   : > { %1067 = vmatmul.f32.gmra.mxu0 %v1025_v16 }
 0x197   : > { %1070 = vmatmul.f32.gmra.mxu0 %v1026_v17 }
 0x19f   : > { %1073 = vmatmul.f32.gmra.mxu0 %v1027_v18 }
 0x1a7   : > { %1076 = vmatmul.f32.gmra.mxu0 %v1028_v19 }
 0x1af   : > { %1079 = vmatmul.f32.gmra.mxu0 %v1029_v20 }
 0x1b7   : > { %1082 = vmatmul.f32.gmra.mxu0 %v1030_v21 }
 0x1bf   : > { %1085 = vmatmul.f32.gmra.mxu0 %v1031_v23 }
 0x1c7   : > { %1088 = vmatmul.f32.gmra.mxu0 %v1032_v24 }
 0x1cf   : > { %1091 = vmatmul.f32.gmra.mxu0 %v1033_v25 }
 0x1d7   : > { %1094 = vmatmul.f32.gmra.mxu0 %v1034_v26 }
 0x1df   : > { %1097 = vmatmul.f32.gmra.mxu0 %v1035_v27 }
 0x1e4   : > { %v1053_v28 = vpop.f32.mrf.mxu0 }
 0x1e5   : > { %v1101_v60 = vmul.f32 %v1053_v28, %v1053_v28 }
 0x1ec   : > { %v1056_v29 = vpop.f32.mrf.mxu0 }
 0x1ed   : > { %v1102_v12 = vmul.f32 %v1056_v29, %v1056_v29 }
 0x1f4   : > { %v1059_v30 = vpop.f32.mrf.mxu0 }
 0x1f5   : > { %v1103_v9 = vmul.f32 %v1059_v30, %v1059_v30 }
 0x1fc   : > { %v1062_v37 = vpop.f32.mrf.mxu0 }
 0x1fd   : > { %v1104_v4 = vmul.f32 %v1062_v37, %v1062_v37 }
 0x204   : > { %v1065_v38 = vpop.f32.mrf.mxu0 }
 0x205   : > { %v1105_v1 = vmul.f32 %v1065_v38, %v1065_v38 }
 0x20c   : > { %v1068_v39 = vpop.f32.mrf.mxu0 }
 0x20d   : > { %v1106_v56 = vmul.f32 %v1068_v39, %v1068_v39 }
 0x214   : > { %v1071_v41 = vpop.f32.mrf.mxu0 }
 0x215   : > { %v1107_v52 = vmul.f32 %v1071_v41, %v1071_v41 }
 0x21c   : > { %v1074_v42 = vpop.f32.mrf.mxu0 }
 0x21d   : > { %v1108_v7 = vmul.f32 %v1074_v42, %v1074_v42 }
 0x224   : > { %v1077_v44 = vpop.f32.mrf.mxu0 }
 0x225   : > { %v1109_v5 = vmul.f32 %v1077_v44, %v1077_v44 }
 0x22c   : > { %v1080_v45 = vpop.f32.mrf.mxu0 }
 0x22d   : > { %v1110_v61 = vmul.f32 %v1080_v45, %v1080_v45 }
 0x234   : > { %v1083_v46 = vpop.f32.mrf.mxu0 }
 0x235   : > { %v1111_v47 = vmul.f32 %v1083_v46, %v1083_v46  ;;  %v3692_v46 = vld [vmem:[%s4064_s6] ss:$0 sm:$0xff] }
 0x237   : > { %1137 = vadd.xlane.f32.xlu2 %v1111_v47 }
 0x23c   : > { %v1086_v48 = vpop.f32.mrf.mxu0 }
 0x23d   : > { %v1112_v49 = vmul.f32 %v1086_v48, %v1086_v48 }
 0x23f   : > { %1139 = vadd.xlane.f32.xlu2 %v1112_v49 }
 0x244   : > { %v1089_v50 = vpop.f32.mrf.mxu0 }
 0x245   : > { %v1113_v53 = vmul.f32 %v1089_v50, %v1089_v50 }
 0x247   : > { %1129 = vadd.xlane.f32.xlu2 %v1107_v52  ;;  %1141 = vadd.xlane.f32.xlu1 %v1113_v53 }
 0x24c   : > { %v1092_v54 = vpop.f32.mrf.mxu0 }
 0x24d   : > { %v1114_v57 = vmul.f32 %v1092_v54, %v1092_v54 }
 0x24f   : > { %1127 = vadd.xlane.f32.xlu2 %v1106_v56  ;;  %1143 = vadd.xlane.f32.xlu1 %v1114_v57  ;;  %v3697_v56 = vstv %s1361_s12 }
 0x254   : > { %v1095_v58 = vpop.f32.mrf.mxu0 }
 0x255   : > { %v1115_v62 = vmul.f32 %v1095_v58, %v1095_v58 }
 0x257   : > { %1117 = vadd.xlane.f32.xlu2 %v1101_v60  ;;  %1135 = vadd.xlane.f32.xlu1 %v1110_v61 }
 0x258   : > { %1145 = vadd.xlane.f32.xlu0 %v1115_v62 }
 0x25c   : > { %v1098_v0 = vpop.f32.mrf.mxu0 }
 0x25d   : > { %v1116_v2 = vmul.f32 %v1098_v0, %v1098_v0 }
 0x25f   : > { %1125 = vadd.xlane.f32.xlu1 %v1105_v1 }
 0x260   : > { %1147 = vadd.xlane.f32.xlu0 %v1116_v2 }
 0x267   : > { %1123 = vadd.xlane.f32.xlu1 %v1104_v4 }
 0x268   : > { %1133 = vadd.xlane.f32.xlu0 %v1109_v5 }
 0x270   : > { %1131 = vadd.xlane.f32.xlu0 %v1108_v7 }
 0x278   : > { %1121 = vadd.xlane.f32.xlu0 %v1103_v9 }
 0x280   : > { %1119 = vadd.xlane.f32.xlu0 %v1102_v12 }
 0x2aa   : > { %v1138_v13 = vpop.xlane.xlu2 %1137 }
 0x2ab   : > { %2790 = vrsqrt.f32 %v1138_v13  ;;  %vm1276_vm0 = vcmp.eq.f32.partialorder %v1138_v13, inf  ;;  %v1279_v42 = vand.u32 2147483648, %v1138_v13  ;;  %vm1278_vm1 = vcmp.eq.f32.partialorder %v1138_v13, 0.0 }
 0x2b1   : > { %v2791_v14 = vpop.eup %2790 }
 0x2b2   : > { %v1270_v8 = vmul.f32 %v2791_v14, %v1138_v13  ;;  %v1140_v15 = vpop.xlane.xlu2 %1139 }
 0x2b3   : > { %2792 = vrsqrt.f32 %v1140_v15  ;;  %vm1288_vm2 = vcmp.eq.f32.partialorder %v1140_v15, inf  ;;  %v1291_v5 = vand.u32 2147483648, %v1140_v15  ;;  %vm1290_vm3 = vcmp.eq.f32.partialorder %v1140_v15, 0.0 }
 0x2b4   : > { %v1271_v16 = vmul.f32 %v2791_v14, %v1270_v8 }
 0x2b6   : > { %v1272_v17 = vmul.f32 0.5, %v1271_v16 }
 0x2b8   : > { %v1273_v18 = vsub.f32 1.5, %v1272_v17 }
 0x2b9   : > { %v2793_v19 = vpop.eup %2792 }
 0x2ba   : > { %v1274_v20 = vmul.f32 %v2791_v14, %v1273_v18  ;;  %v1282_v21 = vmul.f32 %v2793_v19, %v1140_v15  ;;  %v3675_v23 = vpop.xlane.xlu2 %1129  ;;  %v3677_v24 = vpop.xlane.xlu1 %1141 }
 0x2bb   : > { %2794 = vrsqrt.f32 %v3675_v23  ;;  %vm1228_vm4 = vcmp.eq.f32.partialorder %v3675_v23, inf  ;;  %vm1300_vm5 = vcmp.eq.f32.partialorder %v3677_v24, inf  ;;  %vm1302_vm6 = vcmp.eq.f32.partialorder %v3677_v24, 0.0 }
 0x2bc   : > { %v1283_v25 = vmul.f32 %v2793_v19, %v1282_v21  ;;  %2796 = vrsqrt.f32 %v3677_v24  ;;  %v1275_v26 = vmul.f32 %v1274_v20, %v1138_v13  ;;  %vm1230_vm8 = vcmp.eq.f32.partialorder %v3675_v23, 0.0 }
 0x2be   : > { %v1284_v27 = vmul.f32 0.5, %v1283_v25  ;;  %v1277_v41 = vsel %vm1276_vm0, %v1138_v13, %v1275_v26  ;;  %v1231_v25 = vand.u32 2147483648, %v3675_v23 }
 0x2bf   : > { %v1280_v48 = vsel %vm1278_vm1, %v1279_v42, %v1277_v41 }
 0x2c0   : > { %v1285_v28 = vsub.f32 1.5, %v1284_v27  ;;  %v1355_v53 = vsub.f32 %v1280_v48, %v3692_v46 }
 0x2c1   : > { %v2795_v29 = vpop.eup %2794 }
 0x2c2   : > { %v2797_v30 = vpop.eup %2796  ;;  %v1222_v37 = vmul.f32 %v2795_v29, %v3675_v23  ;;  %v3682_v38 = vpop.xlane.xlu2 %1127  ;;  %v1286_v44 = vmul.f32 %v2793_v19, %v1285_v28  ;;  %v1373_v7 = vmul.f32 %v3697_v56, %v1355_v53  ;;  %v1303_v28 = vand.u32 2147483648, %v3677_v24 }
 0x2c3   : > { %v3684_v39 = vpop.xlane.xlu1 %1143  ;;  %v1294_v45 = vmul.f32 %v2797_v30, %v3677_v24  ;;  %2798 = vrsqrt.f32 %v3682_v38  ;;  %vm1216_vm1 = vcmp.eq.f32.partialorder %v3682_v38, inf }
 0x2c4   : > { %2800 = vrsqrt.f32 %v3684_v39  ;;  %v1223_v49 = vmul.f32 %v2795_v29, %v1222_v37  ;;  %v1287_v50 = vmul.f32 %v1286_v44, %v1140_v15  ;;  %v1389_v17 = vmul.f32 %v1373_v7, %v1355_v53 }
 0x2c5   : > { %v1295_v47 = vmul.f32 %v2797_v30, %v1294_v45  ;;  %vm1312_vm7 = vcmp.eq.f32.partialorder %v3684_v39, inf  ;;  %vm1314_vm9 = vcmp.eq.f32.partialorder %v3684_v39, 0.0 }
 0x2c6   : > { %v1224_v58 = vmul.f32 0.5, %v1223_v49  ;;  %v1289_v4 = vsel %vm1288_vm2, %v1140_v15, %v1287_v50  ;;  %v1415_v44 = vmul.f32 1.442695, %v1389_v17  ;;  %vm1218_vm2 = vcmp.eq.f32.partialorder %v3682_v38, 0.0 }
 0x2c7   : > { %v1296_v52 = vmul.f32 0.5, %v1295_v47  ;;  %v1292_v14 = vsel %vm1290_vm3, %v1291_v5, %v1289_v4 }
 0x2c8   : > { %v1225_v12 = vsub.f32 1.5, %v1224_v58  ;;  %v1356_v19 = vsub.f32 %v1292_v14, %v3692_v46 }
 0x2c9   : > { %v3695_v54 = vpop.eup %2798  ;;  %v1297_v60 = vsub.f32 1.5, %v1296_v52 }
 0x2ca   : > { %v2801_v57 = vpop.eup %2800  ;;  %v3699_v61 = vpop.xlane.xlu2 %1117  ;;  %v1210_v0 = vmul.f32 %v3695_v54, %v3682_v38  ;;  %v1226_v21 = vmul.f32 %v2795_v29, %v1225_v12  ;;  %v1219_v29 = vand.u32 2147483648, %v3682_v38  ;;  %v1374_v48 = vmul.f32 %v3697_v56, %v1356_v19 }
 0x2cb   : > { %v3701_v62 = vpop.xlane.xlu1 %1135  ;;  %v1306_v1 = vmul.f32 %v2801_v57, %v3684_v39  ;;  %v3706_v2 = vpop.xlane.xlu0 %1145  ;;  %2802 = vrsqrt.f32 %v3699_v61  ;;  %v1298_v13 = vmul.f32 %v2797_v30, %v1297_v60 }
 0x2cc   : > { %2804 = vrsqrt.f32 %v3701_v62  ;;  %v1211_v8 = vmul.f32 %v3695_v54, %v1210_v0  ;;  %v1227_v49 = vmul.f32 %v1226_v21, %v3675_v23  ;;  %vm1324_vm10 = vcmp.eq.f32.partialorder %v3706_v2, inf }
 0x2cd   : > { %v1307_v9 = vmul.f32 %v2801_v57, %v1306_v1  ;;  %2806 = vrsqrt.f32 %v3706_v2  ;;  %v1299_v15 = vmul.f32 %v1298_v13, %v3677_v24  ;;  %v1267_v1 = vand.u32 2147483648, %v3701_v62 }
 0x2ce   : > { %v1212_v30 = vmul.f32 0.5, %v1211_v8  ;;  %vm1326_vm11 = vcmp.eq.f32.partialorder %v3706_v2, 0.0  ;;  %v1390_v12 = vmul.f32 %v1374_v48, %v1356_v19  ;;  %vm1264_vm12 = vcmp.eq.f32.partialorder %v3701_v62, inf }
 0x2cf   : > { %v1308_v16 = vmul.f32 0.5, %v1307_v9  ;;  %v1301_v53 = vsel %vm1300_vm5, %v3677_v24, %v1299_v15  ;;  %vm1266_vm13 = vcmp.eq.f32.partialorder %v3701_v62, 0.0  ;;  %vm1156_vm5 = vcmp.eq.f32.partialorder %v3699_v61, inf }
 0x2d0   : > { %v1213_v58 = vsub.f32 1.5, %v1212_v30  ;;  %v1304_v9 = vsel %vm1302_vm6, %v1303_v28, %v1301_v53 }
 0x2d1   : > { %v1309_v18 = vsub.f32 1.5, %v1308_v16  ;;  %v3715_v20 = vpop.eup %2802 }
 0x2d2   : > { %v2805_v27 = vpop.eup %2804  ;;  %v1150_v50 = vmul.f32 %v3715_v20, %v3699_v61  ;;  %v1214_v21 = vmul.f32 %v3695_v54, %v1213_v58 }
 0x2d3   : > { %v3720_v26 = vpop.xlane.xlu1 %1125  ;;  %v3724_v37 = vpop.xlane.xlu0 %1147  ;;  %v1258_v42 = vmul.f32 %v2805_v27, %v3701_v62  ;;  %v1310_v45 = vmul.f32 %v2801_v57, %v1309_v18  ;;  %v1315_v57 = vand.u32 2147483648, %v3684_v39  ;;  %v1229_v18 = vsel %vm1228_vm4, %v3675_v23, %v1227_v49 }
 0x2d4   : > { %2808 = vrsqrt.f32 %v3720_v26  ;;  %v2807_v41 = vpop.eup %2806  ;;  %v1151_v14 = vmul.f32 %v3715_v20, %v1150_v50  ;;  %v1207_v58 = vand.u32 2147483648, %v3720_v26  ;;  %vm1336_vm14 = vcmp.eq.f32.partialorder %v3724_v37, inf }
 0x2d5   : > { %2810 = vrsqrt.f32 %v3724_v37  ;;  %v1318_v47 = vmul.f32 %v2807_v41, %v3706_v2  ;;  %v1259_v52 = vmul.f32 %v2805_v27, %v1258_v42  ;;  %v1311_v5 = vmul.f32 %v1310_v45, %v3684_v39 }
 0x2d6   : > { %2812 = vpow2.f32 %v1415_v44  ;;  %v1327_v42 = vand.u32 2147483648, %v3706_v2  ;;  %v1357_v44 = vsub.f32 %v1304_v9, %v3692_v46  ;;  %v1152_v49 = vmul.f32 0.5, %v1151_v14 }
 0x2d7   : > { %v1319_v60 = vmul.f32 %v2807_v41, %v1318_v47  ;;  %v1260_v0 = vmul.f32 0.5, %v1259_v52  ;;  %v1313_v54 = vsel %vm1312_vm7, %v3684_v39, %v1311_v5  ;;  %v1417_v52 = vmul.f32 1.442695, %v1390_v12 }
 0x2d8   : > { %vm1338_vm15 = vcmp.eq.f32.partialorder %v3724_v37, 0.0  ;;  %v1153_v14 = vsub.f32 1.5, %v1152_v49  ;;  %vm1204_vm0 = vcmp.eq.f32.partialorder %v3720_v26, inf  ;;  %vm1206_vm3 = vcmp.eq.f32.partialorder %v3720_v26, 0.0 }
 0x2d9   : > { %v1320_v7 = vmul.f32 0.5, %v1319_v60  ;;  %v1261_v8 = vsub.f32 1.5, %v1260_v0 }
 0x2da   : > { %v2809_v4 = vpop.eup %2808 }
 0x2db   : > { %v2811_v13 = vpop.eup %2810  ;;  %v1198_v16 = vmul.f32 %v2809_v4, %v3720_v26  ;;  %v3750_v17 = vpop.xlane.xlu1 %1123  ;;  %v1321_v15 = vsub.f32 1.5, %v1320_v7  ;;  %v1262_v28 = vmul.f32 %v2805_v27, %v1261_v8  ;;  %v1232_v27 = vsel %vm1230_vm8, %v1231_v25, %v1229_v18 }
 0x2dc   : > { %v1330_v24 = vmul.f32 %v2811_v13, %v3724_v37  ;;  %2814 = vrsqrt.f32 %v3750_v17  ;;  %v3759_v19 = vpop.xlane.xlu0 %1133  ;;  %v3767_v48 = vpop.eup %2812  ;;  %v1316_v7 = vsel %vm1314_vm9, %v1315_v57, %v1313_v54  ;;  %v1375_v25 = vmul.f32 %v3697_v56, %v1357_v44 }
 0x2dd   : > { %v1199_v30 = vmul.f32 %v2809_v4, %v1198_v16  ;;  %v1322_v45 = vmul.f32 %v2807_v41, %v1321_v15  ;;  %2816 = vrsqrt.f32 %v3759_v19  ;;  %v3775_v41 = vmul.f32 %v1214_v21, %v3682_v38 }
 0x2de   : > { %v1331_v47 = vmul.f32 %v2811_v13, %v1330_v24  ;;  %v1263_v0 = vmul.f32 %v1262_v28, %v3701_v62  ;;  %v1339_v18 = vand.u32 2147483648, %v3724_v37  ;;  %v1358_v28 = vsub.f32 %v1316_v7, %v3692_v46 }
 0x2df   : > { %v1200_v50 = vmul.f32 0.5, %v1199_v30  ;;  %v1323_v53 = vmul.f32 %v1322_v45, %v3706_v2  ;;  %v1154_v54 = vmul.f32 %v3715_v20, %v1153_v14  ;;  %vm1192_vm4 = vcmp.eq.f32.partialorder %v3750_v17, inf }
 0x2e0   : > { %v1332_v60 = vmul.f32 0.5, %v1331_v47  ;;  %v3806_v47 = vsub.f32 %v1232_v27, %v3692_v46  ;;  %vm1194_vm6 = vcmp.eq.f32.partialorder %v3750_v17, 0.0  ;;  %vm1252_vm7 = vcmp.eq.f32.partialorder %v3759_v19, inf }
 0x2e1   : > { %v1201_v5 = vsub.f32 1.5, %v1200_v50  ;;  %v1325_v23 = vsel %vm1324_vm10, %v3706_v2, %v1323_v53  ;;  %v1265_v2 = vsel %vm1264_vm12, %v3701_v62, %v1263_v0  ;;  %v1376_v0 = vmul.f32 %v3697_v56, %v1358_v28 }
 0x2e2   : > { %v2815_v9 = vpop.eup %2814  ;;  %v1333_v12 = vsub.f32 1.5, %v1332_v60  ;;  %v1328_v16 = vsel %vm1326_vm11, %v1327_v42, %v1325_v23  ;;  %v1391_v42 = vmul.f32 %v1375_v25, %v1357_v44  ;;  %v1268_v44 = vsel %vm1266_vm13, %v1267_v1, %v1265_v2 }
 0x2e3   : > { %v1186_v8 = vmul.f32 %v2815_v9, %v3750_v17  ;;  %v2817_v39 = vpop.eup %2816  ;;  %v1202_v57 = vmul.f32 %v2809_v4, %v1201_v5  ;;  %v1359_v24 = vsub.f32 %v1328_v16, %v3692_v46  ;;  %v1369_v23 = vmul.f32 %v3697_v56, %v3806_v47 }
 0x2e4   : > { %v1334_v21 = vmul.f32 %v2811_v13, %v1333_v12  ;;  %v3793_v15 = vpop.xlane.xlu0 %1131  ;;  %v1246_v45 = vmul.f32 %v2817_v39, %v3759_v19  ;;  %v1419_v12 = vmul.f32 1.442695, %v1391_v42  ;;  %v1155_v62 = vmul.f32 %v1154_v54, %v3699_v61 }
 0x2e5   : > { %v1187_v30 = vmul.f32 %v2815_v9, %v1186_v8  ;;  %2818 = vrsqrt.f32 %v3793_v15  ;;  %v1377_v13 = vmul.f32 %v3697_v56, %v1359_v24  ;;  %v1203_v53 = vmul.f32 %v1202_v57, %v3720_v26 }
 0x2e6   : > { %v1335_v4 = vmul.f32 %v1334_v21, %v3724_v37  ;;  %v1247_v50 = vmul.f32 %v2817_v39, %v1246_v45  ;;  %2820 = vpow2.f32 %v1417_v52  ;;  %v1354_v57 = vsub.f32 %v1268_v44, %v3692_v46 }
 0x2e7   : > { %v1188_v49 = vmul.f32 0.5, %v1187_v30  ;;  %v1393_v7 = vmul.f32 %v1377_v13, %v1359_v24  ;;  %v1205_v30 = vsel %vm1204_vm0, %v3720_v26, %v1203_v53  ;;  %v1255_v13 = vand.u32 2147483648, %v3759_v19 }
 0x2e8   : > { %v1337_v60 = vsel %vm1336_vm14, %v3724_v37, %v1335_v4  ;;  %v1248_v5 = vmul.f32 0.5, %v1247_v50  ;;  %v1208_v50 = vsel %vm1206_vm3, %v1207_v58, %v1205_v30  ;;  %vm1254_vm8 = vcmp.eq.f32.partialorder %v3759_v19, 0.0 }
 0x2e9   : > { %v1189_v27 = vsub.f32 1.5, %v1188_v49  ;;  %v1340_v20 = vsel %vm1338_vm15, %v1339_v18, %v1337_v60  ;;  %v1392_v18 = vmul.f32 %v1376_v0, %v1358_v28  ;;  %v1372_v60 = vmul.f32 %v3697_v56, %v1354_v57 }
 0x2ea   : > { %v1360_v52 = vsub.f32 %v1340_v20, %v3692_v46  ;;  %v1249_v14 = vsub.f32 1.5, %v1248_v5  ;;  %v1195_v5 = vand.u32 2147483648, %v3750_v17  ;;  %vm1240_vm9 = vcmp.eq.f32.partialorder %v3793_v15, inf }
 0x2eb   : > { %v2819_v25 = vpop.eup %2818  ;;  %v1190_v1 = vmul.f32 %v2815_v9, %v1189_v27  ;;  %v1423_v9 = vmul.f32 1.442695, %v1393_v7  ;;  %v1421_v49 = vmul.f32 1.442695, %v1392_v18  ;;  %v1243_v18 = vand.u32 2147483648, %v3793_v15 }
 0x2ec   : > { %v1234_v37 = vmul.f32 %v2819_v25, %v3793_v15  ;;  %v3829_v8 = vpop.xlane.xlu0 %1121  ;;  %v1378_v16 = vmul.f32 %v3697_v56, %v1360_v52  ;;  %v3833_v21 = vpop.eup %2820  ;;  %v1250_v24 = vmul.f32 %v2817_v39, %v1249_v14  ;;  %v1217_v39 = vsel %vm1216_vm1, %v3682_v38, %v3775_v41 }
 0x2ed   : > { %2822 = vrsqrt.f32 %v3829_v8  ;;  %v1191_v28 = vmul.f32 %v1190_v1, %v3750_v17  ;;  %v1220_v41 = vsel %vm1218_vm2, %v1219_v29, %v1217_v39  ;;  %v1157_v38 = vsel %vm1156_vm5, %v3699_v61, %v1155_v62 }
 0x2ee   : > { %v1235_v45 = vmul.f32 %v2819_v25, %v1234_v37  ;;  %v1394_v2 = vmul.f32 %v1378_v16, %v1360_v52  ;;  %v1251_v4 = vmul.f32 %v1250_v24, %v3759_v19  ;;  %2824 = vpow2.f32 %v1423_v9 }
 0x2ef   : > { %v1193_v26 = vsel %vm1192_vm4, %v3750_v17, %v1191_v28  ;;  %v1388_v29 = vmul.f32 %v1372_v60, %v1354_v57  ;;  %v1385_v62 = vmul.f32 %v1369_v23, %v3806_v47  ;;  %vm1242_vm10 = vcmp.eq.f32.partialorder %v3793_v15, 0.0 }
 0x2f0   : > { %v1236_v42 = vmul.f32 0.5, %v1235_v45  ;;  %v1425_v54 = vmul.f32 1.442695, %v1394_v2  ;;  %v1253_v53 = vsel %vm1252_vm7, %v3759_v19, %v1251_v4  ;;  %v1349_v19 = vsub.f32 %v1208_v50, %v3692_v46 }
 0x2f1   : > { %v1256_v44 = vsel %vm1254_vm8, %v1255_v13, %v1253_v53  ;;  %v1413_v17 = vmul.f32 1.442695, %v1388_v29  ;;  %vm1158_vm11 = vcmp.eq.f32.partialorder %v3699_v61, 0.0  ;;  %v1159_v50 = vand.u32 2147483648, %v3699_v61 }
 0x2f2   : > { %v1237_v0 = vsub.f32 1.5, %v1236_v42  ;;  %2826 = vpow2.f32 %v1425_v54  ;;  %v1353_v58 = vsub.f32 %v1256_v44, %v3692_v46  ;;  %v1367_v24 = vmul.f32 %v3697_v56, %v1349_v19 }
 0x2f3   : > { %v2823_v27 = vpop.eup %2822  ;;  %2828 = vpow2.f32 %v1419_v12  ;;  %v1350_v12 = vsub.f32 %v1220_v41, %v3692_v46  ;;  %vm1180_vm12 = vcmp.eq.f32.partialorder %v3829_v8, inf  ;;  %v1183_v61 = vand.u32 2147483648, %v3829_v8 }
 0x2f4   : > { %v1238_v20 = vmul.f32 %v2819_v25, %v1237_v0  ;;  %v1174_v7 = vmul.f32 %v2823_v27, %v3829_v8  ;;  %v3866_v52 = vpop.xlane.xlu0 %1119  ;;  %2830 = vpow2.f32 %v1421_v49  ;;  %v1371_v37 = vmul.f32 %v3697_v56, %v1353_v58  ;;  %v2825_v16 = vpop.eup %2824 }
 0x2f5   : > { %2832 = vrsqrt.f32 %v3866_v52  ;;  %v1196_v25 = vsel %vm1194_vm6, %v1195_v5, %v1193_v26  ;;  %v1368_v23 = vmul.f32 %v3697_v56, %v1350_v12  ;;  %v1383_v53 = vmul.f32 %v1367_v24, %v1349_v19 }
 0x2f6   : > { %v1239_v1 = vmul.f32 %v1238_v20, %v3793_v15  ;;  %v1175_v14 = vmul.f32 %v2823_v27, %v1174_v7  ;;  %v1387_v30 = vmul.f32 %v1371_v37, %v1353_v58  ;;  %v1348_v13 = vsub.f32 %v1196_v25, %v3692_v46 }
 0x2f7   : > { %v1160_v58 = vsel %vm1158_vm11, %v1159_v50, %v1157_v38  ;;  %v1384_v29 = vmul.f32 %v1368_v23, %v1350_v12  ;;  %vm1182_vm13 = vcmp.eq.f32.partialorder %v3829_v8, 0.0  ;;  %vm1168_vm14 = vcmp.eq.f32.partialorder %v3866_v52, inf }
 0x2f8   : > { %v2827_v57 = vpop.eup %2826  ;;  %v1176_v9 = vmul.f32 0.5, %v1175_v14  ;;  %v1241_v45 = vsel %vm1240_vm9, %v3793_v15, %v1239_v1  ;;  %v1411_v54 = vmul.f32 1.442695, %v1387_v30  ;;  %v1407_v15 = vmul.f32 1.442695, %v1385_v62 }
 0x2f9   : > { %v2829_v2 = vpop.eup %2828  ;;  %v1450_v28 = vpack.c.bf16 %v2827_v57, %v2825_v16  ;;  %v1244_v4 = vsel %vm1242_vm10, %v1243_v18, %v1241_v45  ;;  %v1366_v26 = vmul.f32 %v3697_v56, %v1348_v13  ;;  %v1403_v14 = vmul.f32 1.442695, %v1383_v53 }
 0x2fa   : > { %v2831_v39 = vpop.eup %2830  ;;  %v1177_v42 = vsub.f32 1.5, %v1176_v9  ;;  %v1352_v47 = vsub.f32 %v1244_v4, %v3692_v46  ;;  %2834 = vpow2.f32 %v1411_v54  ;;  %v1345_v12 = vsub.f32 %v1160_v58, %v3692_v46 }
 0x2fb   : > { %v2833_v49 = vpop.eup %2832  ;;  %1499 = vmatpush.bf16.msra.mxu1 %v1450_v28  ;;  %v1449_v41 = vpack.c.bf16 %v2831_v39, %v2829_v2  ;;  %2836 = vpow2.f32 %v1413_v17  ;;  %v1382_v25 = vmul.f32 %v1366_v26, %v1348_v13  ;;  %v1405_v62 = vmul.f32 1.442695, %v1384_v29  ;;  %v2559_v29 = vld [vmem:[#allocation13 + $0x18] sm:$0xff] }
 0x2fc   : > { %v1178_v60 = vmul.f32 %v2823_v27, %v1177_v42  ;;  %v1162_v0 = vmul.f32 %v2833_v49, %v3866_v52  ;;  %v1370_v44 = vmul.f32 %v3697_v56, %v1352_v47  ;;  %v1448_v27 = vpack.c.bf16 %v3833_v21, %v3767_v48 }
 0x2fd   : > { %2838 = vpow2.f32 %v1407_v15  ;;  %v1401_v30 = vmul.f32 1.442695, %v1382_v25  ;;  %v1171_v17 = vand.u32 2147483648, %v3866_v52  ;;  %vm1170_vm15 = vcmp.eq.f32.partialorder %v3866_v52, 0.0  ;;  %v2562_v25 = vld [vmem:[#allocation13 + $0x30] sm:$0xff] }
 0x2fe   : > { %v1179_v5 = vmul.f32 %v1178_v60, %v3829_v8  ;;  %v1163_v20 = vmul.f32 %v2833_v49, %v1162_v0  ;;  %v1386_v7 = vmul.f32 %v1370_v44, %v1352_v47 }
 0x2ff   : > { %1500 = vmatpush.bf16.msra.mxu1 %v1449_v41 }
 0x300   : > { %v1164_v19 = vmul.f32 0.5, %v1163_v20  ;;  %v1409_v1 = vmul.f32 1.442695, %v1386_v7  ;;  %v1181_v38 = vsel %vm1180_vm12, %v3829_v8, %v1179_v5  ;;  %v2835_v16 = vpop.eup %2834  ;;  %v1363_v8 = vmul.f32 %v3697_v56, %v1345_v12  ;;  %v2556_v7 = vld [vmem:[#allocation13] sm:$0xff] }
 0x301   : > { %v1184_v37 = vsel %vm1182_vm13, %v1183_v61, %v1181_v38  ;;  %v2837_v57 = vpop.eup %2836  ;;  %v2560_v61 = vld [vmem:[#allocation13 + $0x20] sm:$0xff] }
 0x302   : > { %v1165_v18 = vsub.f32 1.5, %v1164_v19  ;;  %2840 = vpow2.f32 %v1409_v1  ;;  %v1347_v24 = vsub.f32 %v1184_v37, %v3692_v46  ;;  %v1447_v9 = vpack.c.bf16 %v2837_v57, %v2835_v16  ;;  %v2570_v19 = vld [vmem:[#allocation16 + $0x30] sm:$0xff]  ;;  %v2561_v1 = vld [vmem:[#allocation13 + $0x28] sm:$0xff]  ;;  %v2568_v38 = vld [vmem:[#allocation16 + $0x20] sm:$0xff] }
 0x303   : > { %1501 = vmatpush.bf16.msra.mxu1 %v1448_v27  ;;  %2842 = vpow2.f32 %v1403_v14  ;;  %v2839_v28 = vpop.eup %2838  ;;  %v1379_v47 = vmul.f32 %v1363_v8, %v1345_v12  ;;  %v2571_v27 = vld [vmem:[#allocation16 + $0x38] sm:$0xff]  ;;  %v2569_v14 = vld [vmem:[#allocation16 + $0x28] sm:$0xff]  ;;  %v2566_v12 = vld [vmem:[#allocation16 + $0x10] sm:$0xff] }
 0x304   : > { %v1166_v48 = vmul.f32 %v2833_v49, %v1165_v18  ;;  %v1365_v21 = vmul.f32 %v3697_v56, %v1347_v24  ;;  %2844 = vpow2.f32 %v1405_v62  ;;  %1636 = vmatpush.bf16.msra.mxu2 %v2571_v27  ;;  %v2567_v37 = vld [vmem:[#allocation16 + $0x18] sm:$0xff]  ;;  %v2565_v16 = vld [vmem:[#allocation16 + $0x8] sm:$0xff]  ;;  %v2564_v18 = vld [vmem:[#allocation16] sm:$0xff] }
 0x305   : > { %2846 = vpow2.f32 %v1401_v30  ;;  %v1395_v60 = vmul.f32 1.442695, %v1379_v47  ;;  %v2563_v62 = vld [vmem:[#allocation13 + $0x38] sm:$0xff]  ;;  %v1740_v27 = vld [vmem:[#allocation18 + $0x8] sm:$0xff] }
 0x306   : > { %v1167_v45 = vmul.f32 %v1166_v48, %v3866_v52  ;;  %v1381_v2 = vmul.f32 %v1365_v21, %v1347_v24  ;;  %v1754_v47 = vld [vmem:[#allocation18 + $0x78] sm:$0xff] }
 0x307   : > { %1502 = vmatpush.bf16.msra.mxu1 %v1447_v9  ;;  %1759 = vmatpush.msra.mxu3 %v1754_v47 }
 0x308   : > { %v2841_v4 = vpop.eup %2840  ;;  %v1169_v13 = vsel %vm1168_vm14, %v3866_v52, %v1167_v45  ;;  %v1399_v39 = vmul.f32 1.442695, %v1381_v2  ;;  %1637 = vmatpush.bf16.msra.mxu2 %v2570_v19  ;;  %v1739_v19 = vld [vmem:[#allocation18] sm:$0xff] }
 0x309   : > { %v1446_v42 = vpack.c.bf16 %v2841_v4, %v2839_v28  ;;  %v1172_v54 = vsel %vm1170_vm15, %v1171_v17, %v1169_v13  ;;  %v2843_v23 = vpop.eup %2842 }
 0x30a   : > { %2848 = vpow2.f32 %v1399_v39  ;;  %v1346_v49 = vsub.f32 %v1172_v54, %v3692_v46  ;;  %v2845_v50 = vpop.eup %2844  ;;  %v2557_v46 = vld [vmem:[#allocation13 + $0x8] sm:$0xff] }
 0x30b   : > { %1503 = vmatpush.bf16.msra.mxu1 %v1446_v42  ;;  %v1445_v53 = vpack.c.bf16 %v2845_v50, %v2843_v23  ;;  %v2847_v44 = vpop.eup %2846  ;;  %2850 = vpow2.f32 %v1395_v60  ;;  %v1753_v50 = vld [vmem:[#allocation18 + $0x70] sm:$0xff]  ;;  %v1750_v60 = vld [vmem:[#allocation18 + $0x58] sm:$0xff] }
 0x30c   : > { %v1364_v15 = vmul.f32 %v3697_v56, %v1346_v49  ;;  %v2558_v56 = vld [vmem:[#allocation13 + $0x10] sm:$0xff]  ;;  %1638 = vmatpush.bf16.msra.mxu2 %v2569_v14  ;;  %1760 = vmatpush.msra.mxu3 %v1753_v50 }
 0x30e   : > { %v1380_v0 = vmul.f32 %v1364_v15, %v1346_v49  ;;  %v1752_v15 = vld [vmem:[#allocation18 + $0x68] sm:$0xff] }
 0x30f   : > { %1504 = vmatpush.bf16.msra.mxu1 %v1445_v53  ;;  %v1751_v53 = vld [vmem:[#allocation18 + $0x60] sm:$0xff]  ;;  %1761 = vmatpush.msra.mxu3 %v1752_v15 }
 0x310   : > { %v2849_v41 = vpop.eup %2848  ;;  %v1397_v52 = vmul.f32 1.442695, %v1380_v0  ;;  %1639 = vmatpush.bf16.msra.mxu2 %v2568_v38  ;;  %v1749_v0 = vld [vmem:[#allocation18 + $0x50] sm:$0xff]  ;;  %v1701_v38 = vld [vmem:[%s4068_s10] sm:$0x1] }
 0x311   : > { %v1444_v26 = vpack.c.bf16 %v2847_v44, %v2849_v41  ;;  %v2851_v58 = vpop.eup %2850  ;;  %1762 = vmatpush.msra.mxu3 %v1751_v53  ;;  %v1748_v41 = vld [vmem:[#allocation18 + $0x48] sm:$0xff] }
 0x312   : > { %2852 = vpow2.f32 %v1397_v52  ;;  %v1747_v52 = vld [vmem:[#allocation18 + $0x40] sm:$0xff] }
 0x313   : > { %1505 = vmatpush.bf16.msra.mxu1 %v1444_v26  ;;  %1763 = vmatpush.msra.mxu3 %v1750_v60  ;;  %v1746_v26 = vld [vmem:[#allocation18 + $0x38] sm:$0xff]  ;;  %v1553_v60 = vld [vmem:[#allocation3 + $0x30] sm:$0xff] }
 0x314   : > { %1640 = vmatpush.bf16.msra.mxu2 %v2567_v37  ;;  %v1702_v37 = vstv %s953_s17 }
 0x315   : > { %1764 = vmatpush.msra.mxu3 %v1749_v0 }
 0x317   : > { %1765 = vmatpush.msra.mxu3 %v1748_v41 }
 0x318   : > { %v2853_v5 = vpop.eup %2852  ;;  %1641 = vmatpush.bf16.msra.mxu2 %v2566_v12  ;;  %v1548_v12 = vld [vmem:[#allocation3 + $0x28] sm:$0xff] }
 0x319   : > { %v1443_v20 = vpack.c.bf16 %v2853_v5, %v2851_v58  ;;  %1766 = vmatpush.msra.mxu3 %v1747_v52  ;;  %v1745_v58 = vld [vmem:[#allocation18 + $0x30] sm:$0xff] }
 0x31b   : > { %1506 = vmatpush.bf16.msra.mxu1 %v1443_v20  ;;  %1767 = vmatpush.msra.mxu3 %v1746_v26  ;;  %v1554_v26 = vld [vmem:[#allocation3 + $0x70] sm:$0xff] }
 0x31c   : > { %1642 = vmatpush.bf16.msra.mxu2 %v2565_v16 }
 0x31d   : > { %1768 = vmatpush.msra.mxu3 %v1745_v58 }
 0x31e   : > { %1507 = vmatmul.bf16.vlgmr.msra.gmra.mxu1 %v2556_v7  ;;  %v1744_v7 = vld [vmem:[#allocation18 + $0x28] sm:$0xff] }
 0x31f   : > { %1769 = vmatpush.msra.mxu3 %v1744_v7 }
 0x320   : > { %1643 = vmatpush.bf16.msra.mxu2 %v2564_v18 }
 0x32e   : > { %1512 = vmatmul.bf16.gmra.mxu1 %v2557_v46  ;;  %v1743_v46 = vld [vmem:[#allocation18 + $0x20] sm:$0xff] }
 0x32f   : > { %1770 = vmatpush.msra.mxu3 %v1743_v46  ;;  %v1555_v46 = vld [vmem:[#allocation3 + $0x38] sm:$0xff] }
 0x33e   : > { %1517 = vmatmul.bf16.gmra.mxu1 %v2558_v56  ;;  %v1742_v56 = vld [vmem:[#allocation18 + $0x18] sm:$0xff] }
 0x33f   : > { %1771 = vmatpush.msra.mxu3 %v1742_v56 }
 0x34e   : > { %1522 = vmatmul.bf16.gmra.mxu1 %v2559_v29  ;;  %v1741_v29 = vld [vmem:[#allocation18 + $0x10] sm:$0xff] }
 0x34f   : > { %1772 = vmatpush.msra.mxu3 %v1741_v29 }
 0x351   : > { %1773 = vmatpush.msra.mxu3 %v1740_v27 }
 0x353   : > { %1774 = vmatpush.msra.mxu3 %v1739_v19  ;;  %v1556_v19 = vld [vmem:[#allocation3 + $0x20] sm:$0xff] }
 0x35e   : > { %1527 = vmatmul.bf16.gmra.mxu1 %v2560_v61 }
 0x36e   : > { %1532 = vmatmul.bf16.gmra.mxu1 %v2561_v1 }
 0x37e   : > { %1537 = vmatmul.bf16.gmra.mxu1 %v2562_v25  ;;  %v1703_v25 = vmul.f32 %v1702_v37, %v1701_v38 }
 0x380   : > { %v3913_v16 = vperm.slane %v1703_v25, 0  ;;  %v1557_v25 = vld [vmem:[#allocation3 + $0x78] sm:$0xff] }
 0x38e   : > { %1542 = vmatmul.bf16.gmra.mxu1 %v2563_v62 }
 0x39b   : > { %v1508_v24 = vpop.f32.mrf.mxu1 }
 0x3a3   : > { %v1510_v57 = vpop.f32.mrf.mxu1 }
 0x3a4   : > { %v1564_v48 = vpack.c.bf16 %v1510_v57, %v1508_v24 }
 0x3a6   : > { %1644 = vmatmul.bf16.vlgmr.msra.gmra.mxu2 %v1564_v48  ;;  %v1549_v48 = vld [vmem:[#allocation3 + $0x68] sm:$0xff] }
 0x3ab   : > { %v1513_v21 = vpop.f32.mrf.mxu1 }
 0x3b3   : > { %v1515_v9 = vpop.f32.mrf.mxu1 }
 0x3b4   : > { %v1565_v30 = vpack.c.bf16 %v1515_v9, %v1513_v21 }
 0x3b6   : > { %1649 = vmatmul.bf16.gmra.mxu2 %v1565_v30 }
 0x3bb   : > { %v1518_v8 = vpop.f32.mrf.mxu1 }
 0x3c3   : > { %v1520_v45 = vpop.f32.mrf.mxu1 }
 0x3c4   : > { %v1566_v2 = vpack.c.bf16 %v1520_v45, %v1518_v8  ;;  %v1550_v45 = vld [vmem:[#allocation3 + $0x10] sm:$0xff] }
 0x3c6   : > { %1654 = vmatmul.bf16.gmra.mxu2 %v1566_v2 }
 0x3cb   : > { %v1523_v28 = vpop.f32.mrf.mxu1 }
 0x3d3   : > { %v1525_v17 = vpop.f32.mrf.mxu1 }
 0x3d4   : > { %v1567_v4 = vpack.c.bf16 %v1525_v17, %v1523_v28 }
 0x3d6   : > { %1659 = vmatmul.bf16.gmra.mxu2 %v1567_v4 }
 0x3db   : > { %v1528_v13 = vpop.f32.mrf.mxu1 }
 0x3e3   : > { %v1530_v39 = vpop.f32.mrf.mxu1 }
 0x3e4   : > { %v1568_v42 = vpack.c.bf16 %v1530_v39, %v1528_v13  ;;  %v1551_v13 = vld [vmem:[#allocation3 + $0x40] sm:$0xff] }
 0x3e6   : > { %1664 = vmatmul.bf16.gmra.mxu2 %v1568_v42 }
 0x3eb   : > { %v1533_v54 = vpop.f32.mrf.mxu1 }
 0x3f3   : > { %v1535_v23 = vpop.f32.mrf.mxu1 }
 0x3f4   : > { %v1569_v49 = vpack.c.bf16 %v1535_v23, %v1533_v54  ;;  %v1552_v23 = vld [vmem:[#allocation3 + $0x48] sm:$0xff] }
 0x3f6   : > { %1669 = vmatmul.bf16.gmra.mxu2 %v1569_v49 }
 0x3fb   : > { %v1538_v44 = vpop.f32.mrf.mxu1 }
 0x403   : > { %v1540_v5 = vpop.f32.mrf.mxu1 }
 0x404   : > { %v1570_v20 = vpack.c.bf16 %v1540_v5, %v1538_v44 }
 0x406   : > { %1674 = vmatmul.bf16.gmra.mxu2 %v1570_v20 }
 0x40b   : > { %v1543_v61 = vpop.f32.mrf.mxu1 }
 0x413   : > { %v1545_v1 = vpop.f32.mrf.mxu1 }
 0x414   : > { %v1571_v14 = vpack.c.bf16 %v1545_v1, %v1543_v61 }
 0x416   : > { %1679 = vmatmul.bf16.gmra.mxu2 %v1571_v14 }
 0x429   : > { %v1645_v18 = vpop.f32.mrf.mxu2 }
 0x42a   : > { %v1685_v62 = vadd.f32 %v1645_v18, %v1548_v12 }
 0x42c   : > { %v1707_v24 = vadd.f32 %v3913_v16, %v1685_v62 }
 0x42e   : > { %v1723_v57 = vmax.f32 %v1707_v24, 0.0 }
 0x430   : > { %1775 = vmatmul.f32.vlgmr.msra.gmra.mxu3 %v1723_v57  ;;  %v1558_v57 = vld [vmem:[#allocation3 + $0x18] sm:$0xff] }
 0x431   : > { %v1647_v21 = vpop.f32.mrf.mxu2 }
 0x432   : > { %v1686_v9 = vadd.f32 %v1647_v21, %v1549_v48 }
 0x434   : > { %v1708_v30 = vadd.f32 %v3913_v16, %v1686_v9 }
 0x436   : > { %v1724_v8 = vmax.f32 %v1708_v30, 0.0 }
 0x438   : > { %1778 = vmatmul.f32.gmra.mxu3 %v1724_v8  ;;  %v1559_v8 = vld [vmem:[#allocation3 + $0x58] sm:$0xff] }
 0x439   : > { %v1650_v2 = vpop.f32.mrf.mxu2 }
 0x43a   : > { %v1687_v28 = vadd.f32 %v1650_v2, %v1550_v45 }
 0x43c   : > { %v1709_v17 = vadd.f32 %v3913_v16, %v1687_v28 }
 0x43e   : > { %v1725_v4 = vmax.f32 %v1709_v17, 0.0 }
 0x440   : > { %1781 = vmatmul.f32.gmra.mxu3 %v1725_v4  ;;  %v1560_v4 = vld [vmem:[#allocation3] sm:$0xff] }
 0x441   : > { %v1652_v39 = vpop.f32.mrf.mxu2 }
 0x442   : > { %v1688_v42 = vadd.f32 %v1652_v39, %v1551_v13 }
 0x444   : > { %v1710_v54 = vadd.f32 %v3913_v16, %v1688_v42 }
 0x446   : > { %v1726_v47 = vmax.f32 %v1710_v54, 0.0 }
 0x448   : > { %1784 = vmatmul.f32.gmra.mxu3 %v1726_v47  ;;  %v1561_v47 = vld [vmem:[#allocation3 + $0x8] sm:$0xff] }
 0x449   : > { %v1655_v49 = vpop.f32.mrf.mxu2 }
 0x44a   : > { %v1689_v50 = vadd.f32 %v1655_v49, %v1552_v23 }
 0x44c   : > { %v1711_v15 = vadd.f32 %v3913_v16, %v1689_v50 }
 0x44e   : > { %v1727_v53 = vmax.f32 %v1711_v15, 0.0 }
 0x450   : > { %1787 = vmatmul.f32.gmra.mxu3 %v1727_v53  ;;  %v1562_v53 = vld [vmem:[#allocation3 + $0x60] sm:$0xff] }
 0x451   : > { %v1657_v0 = vpop.f32.mrf.mxu2 }
 0x452   : > { %v1690_v44 = vadd.f32 %v1657_v0, %v1553_v60 }
 0x454   : > { %v1712_v41 = vadd.f32 %v3913_v16, %v1690_v44 }
 0x456   : > { %v1728_v52 = vmax.f32 %v1712_v41, 0.0 }
 0x458   : > { %1790 = vmatmul.f32.gmra.mxu3 %v1728_v52  ;;  %v1563_v52 = vld [vmem:[#allocation3 + $0x50] sm:$0xff] }
 0x459   : > { %v1660_v58 = vpop.f32.mrf.mxu2 }
 0x45a   : > { %v1691_v5 = vadd.f32 %v1660_v58, %v1554_v26 }
 0x45c   : > { %v1713_v20 = vadd.f32 %v3913_v16, %v1691_v5 }
 0x45e   : > { %v1729_v7 = vmax.f32 %v1713_v20, 0.0 }
 0x460   : > { %1793 = vmatmul.f32.gmra.mxu3 %v1729_v7  ;;  %v3935_v7 = vld [vmem:[%s4117_s26] ss:$0 sm:$0xff] }
 0x461   : > { %v1662_v56 = vpop.f32.mrf.mxu2 }
 0x462   : > { %v1692_v29 = vadd.f32 %v1662_v56, %v1555_v46  ;;  %v3937_v56 = vstv %s949_s13 }
 0x464   : > { %v1714_v61 = vadd.f32 %v3913_v16, %v1692_v29  ;;  %v1825_v29 = vmul.f32 %v3606_v22, %v3671_v11 }
 0x466   : > { %v1730_v27 = vmax.f32 %v1714_v61, 0.0 }
 0x468   : > { %1796 = vmatmul.f32.gmra.mxu3 %v1730_v27 }
 0x469   : > { %v1665_v1 = vpop.f32.mrf.mxu2 }
 0x46a   : > { %v1693_v14 = vadd.f32 %v1665_v1, %v1556_v19  ;;  %v1826_v1 = vmul.f32 %v3606_v22, %v3668_v10 }
 0x46c   : > { %v1715_v38 = vadd.f32 %v3913_v16, %v1693_v14 }
 0x46e   : > { %v1731_v37 = vmax.f32 %v1715_v38, 0.0 }
 0x470   : > { %1799 = vmatmul.f32.gmra.mxu3 %v1731_v37 }
 0x471   : > { %v1667_v12 = vpop.f32.mrf.mxu2 }
 0x472   : > { %v1694_v18 = vadd.f32 %v1667_v12, %v1557_v25  ;;  %v1827_v25 = vmul.f32 %v3606_v22, %v3664_v6 }
 0x474   : > { %v1716_v62 = vadd.f32 %v3913_v16, %v1694_v18 }
 0x476   : > { %v1732_v24 = vmax.f32 %v1716_v62, 0.0 }
 0x478   : > { %1802 = vmatmul.f32.gmra.mxu3 %v1732_v24  ;;  %v1828_v24 = vmul.f32 %v3606_v22, %v3660_v3 }
 0x479   : > { %v1670_v48 = vpop.f32.mrf.mxu2 }
 0x47a   : > { %v1695_v21 = vadd.f32 %v1670_v48, %v1558_v57 }
 0x47c   : > { %v1717_v9 = vadd.f32 %v3913_v16, %v1695_v21 }
 0x47e   : > { %v1733_v30 = vmax.f32 %v1717_v9, 0.0  ;;  %v1829_v9 = vmul.f32 %v3606_v22, %v3655_v63 }
 0x480   : > { %1805 = vmatmul.f32.gmra.mxu3 %v1733_v30 }
 0x481   : > { %v1672_v45 = vpop.f32.mrf.mxu2 }
 0x482   : > { %v1696_v2 = vadd.f32 %v1672_v45, %v1559_v8 }
 0x484   : > { %v1718_v28 = vadd.f32 %v3913_v16, %v1696_v2  ;;  %v1830_v2 = vmul.f32 %v3606_v22, %v3650_v59 }
 0x486   : > { %v1734_v17 = vmax.f32 %v1718_v28, 0.0 }
 0x488   : > { %1808 = vmatmul.f32.gmra.mxu3 %v1734_v17 }
 0x489   : > { %v1675_v13 = vpop.f32.mrf.mxu2 }
 0x48a   : > { %v1697_v39 = vadd.f32 %v1675_v13, %v1560_v4  ;;  %v1831_v13 = vmul.f32 %v3606_v22, %v3645_v55 }
 0x48c   : > { %v1719_v42 = vadd.f32 %v3913_v16, %v1697_v39 }
 0x48e   : > { %v1735_v54 = vmax.f32 %v1719_v42, 0.0 }
 0x490   : > { %1811 = vmatmul.f32.gmra.mxu3 %v1735_v54 }
 0x491   : > { %v1677_v23 = vpop.f32.mrf.mxu2 }
 0x492   : > { %v1698_v49 = vadd.f32 %v1677_v23, %v1561_v47  ;;  %v1832_v47 = vmul.f32 %v3606_v22, %v3641_v51 }
 0x494   : > { %v1720_v50 = vadd.f32 %v3913_v16, %v1698_v49 }
 0x496   : > { %v1736_v15 = vmax.f32 %v1720_v50, 0.0 }
 0x498   : > { %1814 = vmatmul.f32.gmra.mxu3 %v1736_v15 }
 0x499   : > { %v1680_v60 = vpop.f32.mrf.mxu2 }
 0x49a   : > { %v1699_v0 = vadd.f32 %v1680_v60, %v1562_v53 }
 0x49c   : > { %v1721_v44 = vadd.f32 %v3913_v16, %v1699_v0 }
 0x49e   : > { %v1737_v41 = vmax.f32 %v1721_v44, 0.0 }
 0x4a0   : > { %1817 = vmatmul.f32.gmra.mxu3 %v1737_v41 }
 0x4a1   : > { %v1682_v26 = vpop.f32.mrf.mxu2 }
 0x4a2   : > { %v1700_v58 = vadd.f32 %v1682_v26, %v1563_v52 }
 0x4a4   : > { %v1722_v5 = vadd.f32 %v3913_v16, %v1700_v58 }
 0x4a6   : > { %v1738_v20 = vmax.f32 %v1722_v5, 0.0 }
 0x4a8   : > { %1820 = vmatmul.f32.gmra.mxu3 %v1738_v20 }
 0x4b3   : > { %v1776_v46 = vpop.f32.mrf.mxu3 }
 0x4b4   : > { %v1777_v61 = vadd.f32 %v3935_v7, %v1776_v46 }
 0x4b6   : > { %v1842_v16 = vmul.f32 %v3937_v56, %v1777_v61 }
 0x4b8   : > { %v1858_v27 = vsub.f32 %v1825_v29, %v1842_v16 }
 0x4ba   : > { %1874 = vst [vmem:[#allocation2 + $0x30] sm:$0xff] %v1858_v27 }
 0x4bb   : > { %1890 = vst [vmem:[%s3579_s22] sm:$0xff] %v1858_v27  ;;  %v1779_v19 = vpop.f32.mrf.mxu3 }
 0x4bc   : > { %v1780_v14 = vadd.f32 %v3935_v7, %v1779_v19 }
 0x4be   : > { %v1843_v38 = vmul.f32 %v3937_v56, %v1780_v14 }
 0x4c0   : > { %v1859_v37 = vsub.f32 %v1826_v1, %v1843_v38 }
 0x4c2   : > { %1875 = vst [vmem:[#allocation2] sm:$0xff] %v1859_v37 }
 0x4c3   : > { %1891 = vst [vmem:[%s3579_s22 + $0x8] sm:$0xff] %v1859_v37  ;;  %v1782_v11 = vpop.f32.mrf.mxu3 }
 0x4c4   : > { %v1783_v12 = vadd.f32 %v3935_v7, %v1782_v11 }
 0x4c6   : > { %v1844_v18 = vmul.f32 %v3937_v56, %v1783_v12 }
 0x4c8   : > { %v1860_v62 = vsub.f32 %v1827_v25, %v1844_v18 }
 0x4ca   : > { %1876 = vst [vmem:[#allocation2 + $0x58] sm:$0xff] %v1860_v62 }
 0x4cb   : > { %1892 = vst [vmem:[%s3579_s22 + $0x10] sm:$0xff] %v1860_v62  ;;  %v1785_v10 = vpop.f32.mrf.mxu3 }
 0x4cc   : > { %v1786_v57 = vadd.f32 %v3935_v7, %v1785_v10 }
 0x4ce   : > { %v1845_v48 = vmul.f32 %v3937_v56, %v1786_v57 }
 0x4d0   : > { %v1861_v21 = vsub.f32 %v1828_v24, %v1845_v48 }
 0x4d2   : > { %1877 = vst [vmem:[#allocation2 + $0x18] sm:$0xff] %v1861_v21 }
 0x4d3   : > { %1893 = vst [vmem:[%s3579_s22 + $0x18] sm:$0xff] %v1861_v21  ;;  %v1788_v6 = vpop.f32.mrf.mxu3 }
 0x4d4   : > { %v1789_v30 = vadd.f32 %v3935_v7, %v1788_v6 }
 0x4d6   : > { %v1846_v8 = vmul.f32 %v3937_v56, %v1789_v30 }
 0x4d8   : > { %v1862_v45 = vsub.f32 %v1829_v9, %v1846_v8 }
 0x4da   : > { %1878 = vst [vmem:[#allocation2 + $0x50] sm:$0xff] %v1862_v45 }
 0x4db   : > { %1894 = vst [vmem:[%s3579_s22 + $0x20] sm:$0xff] %v1862_v45  ;;  %v1791_v3 = vpop.f32.mrf.mxu3 }
 0x4dc   : > { %v1792_v28 = vadd.f32 %v3935_v7, %v1791_v3 }
 0x4de   : > { %v1847_v17 = vmul.f32 %v3937_v56, %v1792_v28 }
 0x4e0   : > { %v1863_v4 = vsub.f32 %v1830_v2, %v1847_v17 }
 0x4e2   : > { %1879 = vst [vmem:[#allocation2 + $0x68] sm:$0xff] %v1863_v4 }
 0x4e3   : > { %1895 = vst [vmem:[%s3579_s22 + $0x28] sm:$0xff] %v1863_v4  ;;  %v1794_v63 = vpop.f32.mrf.mxu3 }
 0x4e4   : > { %v1795_v39 = vadd.f32 %v3935_v7, %v1794_v63 }
 0x4e6   : > { %v1848_v42 = vmul.f32 %v3937_v56, %v1795_v39 }
 0x4e8   : > { %v1864_v54 = vsub.f32 %v1831_v13, %v1848_v42 }
 0x4ea   : > { %1880 = vst [vmem:[#allocation2 + $0x8] sm:$0xff] %v1864_v54 }
 0x4eb   : > { %1896 = vst [vmem:[%s3579_s22 + $0x30] sm:$0xff] %v1864_v54  ;;  %v1797_v59 = vpop.f32.mrf.mxu3 }
 0x4ec   : > { %v1798_v23 = vadd.f32 %v3935_v7, %v1797_v59 }
 0x4ee   : > { %v1849_v49 = vmul.f32 %v3937_v56, %v1798_v23 }
 0x4f0   : > { %v1865_v50 = vsub.f32 %v1832_v47, %v1849_v49 }
 0x4f2   : > { %1881 = vst [vmem:[#allocation2 + $0x48] sm:$0xff] %v1865_v50 }
 0x4f3   : > { %1897 = vst [vmem:[%s3579_s22 + $0x38] sm:$0xff] %v1865_v50  ;;  %v1800_v55 = vpop.f32.mrf.mxu3 }
 0x4f4   : > { %v1801_v15 = vadd.f32 %v3935_v7, %v1800_v55 }
 0x4f6   : > { %v1850_v53 = vmul.f32 %v3937_v56, %v1801_v15 }
 0x4f8   : > { %v1866_v60 = vsub.f32 %v3634_v43, %v1850_v53 }
 0x4fa   : > { %1882 = vst [vmem:[#allocation2 + $0x40] sm:$0xff] %v1866_v60 }
 0x4fb   : > { %1898 = vst [vmem:[%s3579_s22 + $0x40] sm:$0xff] %v1866_v60  ;;  %v1803_v0 = vpop.f32.mrf.mxu3 }
 0x4fc   : > { %v1804_v22 = vadd.f32 %v3935_v7, %v1803_v0 }
 0x4fe   : > { %v1851_v51 = vmul.f32 %v3937_v56, %v1804_v22 }
 0x500   : > { %v1867_v44 = vsub.f32 %v3630_v40, %v1851_v51 }
 0x502   : > { %1883 = vst [vmem:[#allocation2 + $0x20] sm:$0xff] %v1867_v44 }
 0x503   : > { %1899 = vst [vmem:[%s3579_s22 + $0x48] sm:$0xff] %v1867_v44  ;;  %v1806_v41 = vpop.f32.mrf.mxu3 }
 0x504   : > { %v1807_v52 = vadd.f32 %v3935_v7, %v1806_v41 }
 0x506   : > { %v1852_v26 = vmul.f32 %v3937_v56, %v1807_v52 }
 0x508   : > { %v1868_v43 = vsub.f32 %v3626_v36, %v1852_v26 }
 0x50a   : > { %1884 = vst [vmem:[#allocation2 + $0x10] sm:$0xff] %v1868_v43 }
 0x50b   : > { %1900 = vst [vmem:[%s3579_s22 + $0x50] sm:$0xff] %v1868_v43  ;;  %v1809_v58 = vpop.f32.mrf.mxu3 }
 0x50c   : > { %v1810_v5 = vadd.f32 %v3935_v7, %v1809_v58 }
 0x50e   : > { %v1853_v20 = vmul.f32 %v3937_v56, %v1810_v5 }
 0x510   : > { %v1869_v40 = vsub.f32 %v3623_v35, %v1853_v20 }
 0x512   : > { %1885 = vst [vmem:[#allocation2 + $0x38] sm:$0xff] %v1869_v40 }
 0x513   : > { %1901 = vst [vmem:[%s3579_s22 + $0x58] sm:$0xff] %v1869_v40  ;;  %v1812_v46 = vpop.f32.mrf.mxu3 }
 0x514   : > { %v1813_v29 = vadd.f32 %v3935_v7, %v1812_v46 }
 0x516   : > { %v1854_v61 = vmul.f32 %v3937_v56, %v1813_v29 }
 0x518   : > { %v1870_v36 = vsub.f32 %v3620_v34, %v1854_v61 }
 0x51a   : > { %1886 = vst [vmem:[#allocation2 + $0x60] sm:$0xff] %v1870_v36 }
 0x51b   : > { %1902 = vst [vmem:[%s3579_s22 + $0x60] sm:$0xff] %v1870_v36  ;;  %v1815_v16 = vpop.f32.mrf.mxu3 }
 0x51c   : > { %v1816_v27 = vadd.f32 %v3935_v7, %v1815_v16 }
 0x51e   : > { %v1855_v19 = vmul.f32 %v3937_v56, %v1816_v27 }
 0x520   : > { %v1871_v35 = vsub.f32 %v3617_v33, %v1855_v19 }
 0x522   : > { %1887 = vst [vmem:[#allocation2 + $0x70] sm:$0xff] %v1871_v35 }
 0x523   : > { %1903 = vst [vmem:[%s3579_s22 + $0x68] sm:$0xff] %v1871_v35  ;;  %v1818_v1 = vpop.f32.mrf.mxu3 }
 0x524   : > { %v1819_v14 = vadd.f32 %v3935_v7, %v1818_v1 }
 0x526   : > { %v1856_v38 = vmul.f32 %v3937_v56, %v1819_v14 }
 0x528   : > { %v1872_v37 = vsub.f32 %v3614_v32, %v1856_v38 }
 0x52a   : > { %1888 = vst [vmem:[#allocation2 + $0x78] sm:$0xff] %v1872_v37 }
 0x52b   : > { %1904 = vst [vmem:[%s3579_s22 + $0x70] sm:$0xff] %v1872_v37  ;;  %v1821_v34 = vpop.f32.mrf.mxu3 }
 0x52c   : > { %v1822_v11 = vadd.f32 %v3935_v7, %v1821_v34 }
 0x52e   : > { %v1857_v25 = vmul.f32 %v3937_v56, %v1822_v11 }
 0x52f   : > { %1909 = sbr.rel (%p2467_p3) target bundleno = 1525 (0x5f5), region = 132 }
 0x530   : > { %v1873_v12 = vsub.f32 %v3611_v31, %v1857_v25 }
 0x532   : > { %1889 = vst [vmem:[#allocation2 + $0x28] sm:$0xff] %v1873_v12 }
 0x533   : > { %1905 = vst [vmem:[%s3579_s22 + $0x78] sm:$0xff] %v1873_v12 }
 0x534   : > { %v2587_v33 = vld [vmem:[#allocation19 + $0x38] sm:$0xff]  ;;  %v2586_v18 = vld [vmem:[#allocation19 + $0x30] sm:$0xff]  ;;  %v2585_v32 = vld [vmem:[#allocation19 + $0x28] sm:$0xff] }
 0x535   : > { %2042 = vmatpush.bf16.msra.mxu0 %v2587_v33  ;;  %2613 = vmatpush.bf16.msra.mxu1 %v2587_v33  ;;  %v2584_v7 = vld [vmem:[#allocation19 + $0x20] sm:$0xff]  ;;  %v2583_v31 = vld [vmem:[#allocation19 + $0x18] sm:$0xff]  ;;  %v2582_v56 = vld [vmem:[#allocation19 + $0x10] sm:$0xff] }
 0x536   : > { %2614 = vmatpush.bf16.msra.mxu2 %v2587_v33  ;;  %2615 = vmatpush.bf16.msra.mxu3 %v2587_v33  ;;  %v2581_v62 = vld [vmem:[#allocation19 + $0x8] sm:$0xff]  ;;  %v2580_v10 = vld [vmem:[#allocation19] sm:$0xff]  ;;  %v2574_v57 = vld [vmem:[#allocation10 + $0x10] sm:$0xff] }
 0x537   : > { %v2572_v24 = vld [vmem:[#allocation10] sm:$0xff]  ;;  %v2578_v21 = vld [vmem:[#allocation10 + $0x30] sm:$0xff]  ;;  %v2573_v6 = vld [vmem:[#allocation10 + $0x8] sm:$0xff] }
 0x538   : > { %v2576_v48 = vld [vmem:[#allocation10 + $0x20] sm:$0xff]  ;;  %v2575_v9 = vld [vmem:[#allocation10 + $0x18] sm:$0xff]  ;;  %v2577_v30 = vld [vmem:[#allocation10 + $0x28] sm:$0xff] }
 0x539   : > { %2043 = vmatpush.bf16.msra.mxu0 %v2586_v18  ;;  %2616 = vmatpush.bf16.msra.mxu1 %v2586_v18  ;;  %v2579_v8 = vld [vmem:[#allocation10 + $0x38] sm:$0xff]  ;;  %v2854_v45 = vld [vmem:[%s4118_s14] ss:$0 sm:$0xff] }
 0x53a   : > { %2617 = vmatpush.bf16.msra.mxu2 %v2586_v18  ;;  %2618 = vmatpush.bf16.msra.mxu3 %v2586_v18 }
 0x53d   : > { %2044 = vmatpush.bf16.msra.mxu0 %v2585_v32  ;;  %2619 = vmatpush.bf16.msra.mxu1 %v2585_v32 }
 0x53e   : > { %2620 = vmatpush.bf16.msra.mxu2 %v2585_v32  ;;  %2621 = vmatpush.bf16.msra.mxu3 %v2585_v32 }
 0x541   : > { %2045 = vmatpush.bf16.msra.mxu0 %v2584_v7  ;;  %2622 = vmatpush.bf16.msra.mxu1 %v2584_v7 }
 0x542   : > { %2623 = vmatpush.bf16.msra.mxu2 %v2584_v7  ;;  %2624 = vmatpush.bf16.msra.mxu3 %v2584_v7 }
 0x545   : > { %2046 = vmatpush.bf16.msra.mxu0 %v2583_v31  ;;  %2625 = vmatpush.bf16.msra.mxu1 %v2583_v31 }
 0x546   : > { %2626 = vmatpush.bf16.msra.mxu2 %v2583_v31  ;;  %2627 = vmatpush.bf16.msra.mxu3 %v2583_v31 }
 0x549   : > { %2047 = vmatpush.bf16.msra.mxu0 %v2582_v56  ;;  %2628 = vmatpush.bf16.msra.mxu1 %v2582_v56 }
 0x54a   : > { %2629 = vmatpush.bf16.msra.mxu2 %v2582_v56  ;;  %2630 = vmatpush.bf16.msra.mxu3 %v2582_v56 }
 0x54d   : > { %2048 = vmatpush.bf16.msra.mxu0 %v2581_v62  ;;  %2631 = vmatpush.bf16.msra.mxu1 %v2581_v62 }
 0x54e   : > { %2632 = vmatpush.bf16.msra.mxu2 %v2581_v62  ;;  %2633 = vmatpush.bf16.msra.mxu3 %v2581_v62 }
 0x551   : > { %2049 = vmatpush.bf16.msra.mxu0 %v2580_v10  ;;  %2634 = vmatpush.bf16.msra.mxu1 %v2580_v10 }
 0x552   : > { %2635 = vmatpush.bf16.msra.mxu2 %v2580_v10  ;;  %2636 = vmatpush.bf16.msra.mxu3 %v2580_v10 }
 0x554   : > { %2050 = vmatmul.bf16.vlgmr.msra.gmra.mxu0 %v2572_v24  ;;  %2060 = vmatmul.bf16.vlgmr.msra.gmra.mxu1 %v2574_v57 }
 0x555   : > { %2070 = vmatmul.bf16.vlgmr.msra.gmra.mxu2 %v2576_v48  ;;  %2080 = vmatmul.bf16.vlgmr.msra.gmra.mxu3 %v2578_v21 }
 0x564   : > { %2055 = vmatmul.bf16.gmra.mxu0 %v2573_v6  ;;  %2065 = vmatmul.bf16.gmra.mxu1 %v2575_v9 }
 0x565   : > { %2075 = vmatmul.bf16.gmra.mxu2 %v2577_v30  ;;  %2085 = vmatmul.bf16.gmra.mxu3 %v2579_v8 }
 0x5d1   : > { %v2051_v3 = vpop.f32.mrf.mxu0  ;;  %v2061_v2 = vpop.f32.mrf.mxu1 }
 0x5d2   : > { %v2052_v28 = vadd.f32 %v2854_v45, %v2051_v3  ;;  %v2062_v17 = vadd.f32 %v2854_v45, %v2061_v2 }
 0x5d4   : > { %2091 = vst [vmem:[#allocation23] sm:$0xff] %v2052_v28 }
 0x5d5   : > { %2095 = vst [vmem:[#allocation23 + $0x20] sm:$0xff] %v2062_v17 }
 0x5d8   : > { %v2071_v4 = vpop.f32.mrf.mxu2  ;;  %v2081_v63 = vpop.f32.mrf.mxu3 }
 0x5d9   : > { %v2072_v13 = vadd.f32 %v2854_v45, %v2071_v4  ;;  %v2082_v39 = vadd.f32 %v2854_v45, %v2081_v63  ;;  %v2053_v42 = vpop.f32.mrf.mxu0  ;;  %v2063_v54 = vpop.f32.mrf.mxu1 }
 0x5da   : > { %v2054_v59 = vadd.f32 %v2854_v45, %v2053_v42  ;;  %v2064_v47 = vadd.f32 %v2854_v45, %v2063_v54 }
 0x5db   : > { %2099 = vst [vmem:[#allocation23 + $0x40] sm:$0xff] %v2072_v13 }
 0x5dc   : > { %2103 = vst [vmem:[#allocation23 + $0x60] sm:$0xff] %v2082_v39 }
 0x5dd   : > { %2092 = vst [vmem:[#allocation23 + $0x8] sm:$0xff] %v2054_v59 }
 0x5de   : > { %2096 = vst [vmem:[#allocation23 + $0x28] sm:$0xff] %v2064_v47 }
 0x5e0   : > { %v2073_v23 = vpop.f32.mrf.mxu2  ;;  %v2083_v49 = vpop.f32.mrf.mxu3 }
 0x5e1   : > { %v2074_v50 = vadd.f32 %v2854_v45, %v2073_v23  ;;  %v2084_v55 = vadd.f32 %v2854_v45, %v2083_v49  ;;  %v2056_v15 = vpop.f32.mrf.mxu0  ;;  %v2066_v53 = vpop.f32.mrf.mxu1 }
 0x5e2   : > { %v2057_v60 = vadd.f32 %v2854_v45, %v2056_v15  ;;  %v2067_v0 = vadd.f32 %v2854_v45, %v2066_v53 }
 0x5e3   : > { %2100 = vst [vmem:[#allocation23 + $0x48] sm:$0xff] %v2074_v50 }
 0x5e4   : > { %2104 = vst [vmem:[#allocation23 + $0x68] sm:$0xff] %v2084_v55 }
 0x5e5   : > { %2093 = vst [vmem:[#allocation23 + $0x10] sm:$0xff] %v2057_v60 }
 0x5e6   : > { %2097 = vst [vmem:[#allocation23 + $0x30] sm:$0xff] %v2067_v0 }
 0x5e8   : > { %v2076_v22 = vpop.f32.mrf.mxu2  ;;  %v2086_v51 = vpop.f32.mrf.mxu3 }
 0x5e9   : > { %v2077_v44 = vadd.f32 %v2854_v45, %v2076_v22  ;;  %v2087_v41 = vadd.f32 %v2854_v45, %v2086_v51  ;;  %v2058_v52 = vpop.f32.mrf.mxu0  ;;  %v2068_v26 = vpop.f32.mrf.mxu1 }
 0x5ea   : > { %v2059_v43 = vadd.f32 %v2854_v45, %v2058_v52  ;;  %v2069_v58 = vadd.f32 %v2854_v45, %v2068_v26 }
 0x5eb   : > { %2101 = vst [vmem:[#allocation23 + $0x50] sm:$0xff] %v2077_v44 }
 0x5ec   : > { %2105 = vst [vmem:[#allocation23 + $0x70] sm:$0xff] %v2087_v41 }
 0x5ed   : > { %2094 = vst [vmem:[#allocation23 + $0x18] sm:$0xff] %v2059_v43 }
 0x5ee   : > { %2098 = vst [vmem:[#allocation23 + $0x38] sm:$0xff] %v2069_v58 }
 0x5f0   : > { %v2078_v5 = vpop.f32.mrf.mxu2  ;;  %v2088_v20 = vpop.f32.mrf.mxu3 }
 0x5f1   : > { %v2079_v40 = vadd.f32 %v2854_v45, %v2078_v5  ;;  %v2089_v46 = vadd.f32 %v2854_v45, %v2088_v20 }
 0x5f3   : > { %2102 = vst [vmem:[#allocation23 + $0x58] sm:$0xff] %v2079_v40 }
 0x5f4   : > { %2106 = vst [vmem:[#allocation23 + $0x78] sm:$0xff] %v2089_v46 }
 0x5f5 PF: > { %s4119_s4 = sld [smem:[#allocation47_spill]]  ;;  %s2120_s7 = sshll.u32 %s3579_s22, 4  ;;  %s2121_s7 = int_to_ptr.vmem [resolvable:$true] %s2120_s7 }
 0x5f6   : > { %s2108_s25 = scalar_lea.sflag [#allocation7], %s658_s8 }
 0x5fb   : > { %s2119_s12 = scalar_lea.hbm %s4119_s4, %s3587_s23  ;;  %s3160_s18 = scalar_lea.hbm %s4119_s4, 512 }
 0x5fc   : > { %s2122_s17 = sshll.u32 %s2119_s12, 4  ;;  %s2123_s17 = int_to_ptr.hbm [resolvable:$true] %s2122_s17 }
 0x5fd   : > { %s3154_s5 = sshra.s32 %s2123_s17, 4  ;;  %s3155_s5 = int_to_ptr.hbm [resolvable:$true] %s3154_s5 }
 0x5fe   : > { %s3156_s11 = scalar_lea.hbm %s3155_s5, 128  ;;  %p3161_p7 = scmp.lt.s32.totalorder %s3155_s5, %s4119_s4 }
 0x5ff   : > { %p3157_p4 = scmp.ne.s32.totalorder %s3155_s5, %s3156_s11  ;;  %p3162_p8 = scmp.lt.s32.totalorder %s3160_s18, %s3156_s11 }
 0x601   : > { %p3158_p11 = pnand %p3157_p4, %p3509_p0  ;;  %p3163_p9 = por %p3162_p8, %p3161_p7 }
 0x603   : > { %p3159_p13 = pneg %p3158_p11 }
 0x605   : > { %p3164_p10 = pnand %p3163_p9, %p3159_p13 }
 0x607   : > { %3167 = shalt.err (!%p3164_p10)
}
 0x608   : > { %s3277_s8 = smov 128   ;;  %s3278_s22 = smov 8  }
 0x609   : > { %2675 = dma.vmem_to_hbm [thread:$0]  (%p3509_p0), %s2121_s7, 2048, %s2123_s17, %s2108_s25, %s3277_s8, %s3277_s8, %s3278_s22  }
 0x60a   : > { %s4120_s14 = sld [smem:[#allocation48_spill]]  ;;  %s3279_s30 = smov [#allocation23]  }
 0x60b   : > { %s2134_s12 = sshll.u32 %s3279_s30, 4  ;;  %p4121_p2 = scmp.eq.s32.totalorder %s3397_s1, 3  ;;  %s2135_s12 = int_to_ptr.vmem [resolvable:$true] %s2134_s12 }
 0x60d   : > { %p4122_p12 = pmov %p4121_p2 }
 0x610   : > { %s2136_s21 = sshll.u32 %s4120_s14, 4  ;;  %s2137_s21 = int_to_ptr.hbm [resolvable:$true] %s2136_s21 }
 0x611   : > { %2677 = dma.vmem_to_hbm [thread:$0]  (%p4121_p2), %s2135_s12, 2048, %s2137_s21, [#allocation24], %s3277_s8, %s3277_s8, %s3278_s22  }
 0x612   : > { %3241 = dma.done.wait (%p4122_p12), [#allocation24], 2048   ;;  %p4123_p5 = pmov %p4121_p2 }
 0x614   : > { %3243 = vsyncadd (%p4123_p5), [#allocation24], 4294965248 }
 0x615 PF: > { %p2738_p0 = scmp.ge.s32.totalorder %s3262_s0, 2  ;;  %s2156_s24 = sand.u32 1, %s3250_s27  }
 0x616   : > { %s2157_s7 = scalar_lea.sflag [#allocation7], %s2156_s24 }
 0x617   : > { %p2714_p1 = pnand %p2738_p0, %p3515_p6 }
 0x619   : > { %p2715_p3 = pneg %p2714_p1 }
 0x61b   : > { %3245 = dma.done.wait (%p2715_p3), %s2157_s7, 2048  }
 0x61c   : > { %3247 = vsyncadd (%p2715_p3), %s2157_s7, 4294965248  ;;  %s4124_s17 = sld [smem:[#allocation34_spill]]  ;;  %p36_p4 = scmp.ge.s32.totalorder %s3483_s19, 6  }
 0x61d   : > { %s4125_s27 = smov %s3254_s28  ;;  %s4126_s28 = smov %s3258_s29 }
 0x61e   : > { %s4128_s0 = smov %s3483_s19  ;;  %38 = sbr.rel (!%p36_p4) target bundleno = 32 (0x20), region = 181 }
 0x622   : > { %s4127_s29 = smov %s4124_s17 }
 0x623   :  { %2163 = vsyncpa [#allocation6], 1 }
 0x624   :  { %2165 = vsyncpa [#allocation6 + $0x1], 1 }
 0x625   :  { %2166 = vsyncpa [#allocation11], 1 }
 0x626   :  { %2167 = vsyncpa [#allocation14], 1 }
 0x627   :  { %2168 = vsyncpa [#allocation17], 1 }
 0x628   :  { %2169 = vsyncpa [#allocation20], 1 }
 0x629   :  { %2170 = vsyncpa [#allocation7], 1 }
 0x62a   :  { %2172 = vsyncpa [#allocation7 + $0x1], 1 }
 0x62b   :  { %2173 = vsyncpa [#allocation24], 1 }
 0x62c   :  { %2174 = vsyncpa [#allocation8], 1 }
 0x62d   :  { %2176 = vsyncpa [#allocation8 + $0x1], 1 }

</bundles_post_ra>
